<compile_context>
chip_gen: v7x
topology: tpu7x:2x2x1
jax: 0.10.0
libtpu: 0.0.40
codegen_flags: <defaults>
</compile_context>

<pallas_src>
import jax
import jax.numpy as jnp
from jax import lax
from jax.experimental import pallas as pl
from jax.experimental.pallas import tpu as pltpu


def _lstm_net_kernel(ids_ref, emb_ref,
                     wih0_ref, whh0_ref, b0_ref,
                     wih1_ref, whh1_ref, b1_ref,
                     wlin_ref, blin_ref,
                     h0_ref, c0_ref,
                     logits_ref, hn_ref, cn_ref,
                     hs_sc, xp_sc):
    """Whole forward pass (including the embedding lookup) in one kernel.

    ids_ref   : (S*B, 1) int32  token ids, time-major then batch
    emb_ref   : (V, E)          embedding table
    wih0_ref  : (E, 4H)  layer-0 input weights (transposed, [i,f,g,o])
    whh0_ref  : (H, 4H)  layer-0 recurrent weights
    b0_ref    : (1, 4H)  layer-0 combined bias (b_ih + b_hh)
    wih1_ref  : (H, 4H)  layer-1 input weights
    whh1_ref  : (H, 4H)  layer-1 recurrent weights
    b1_ref    : (1, 4H)  layer-1 combined bias
    wlin_ref  : (H, V)   output projection (transposed)
    blin_ref  : (1, V)   output projection bias
    h0_ref/c0_ref : (2, B, H) initial hidden/cell state
    logits_ref: (S*B, V) logits (output, already flattened like .view())
    hn_ref/cn_ref : (2, B, H) final hidden/cell state (outputs)
    hs_sc     : (S*B, H)  VMEM scratch, per-step layer-1 hidden states
    xp_sc     : (S*B, 4H) VMEM scratch, hoisted layer-0 input projection
    """
    SB = ids_ref.shape[0]
    V, E = emb_ref.shape
    H = whh0_ref.shape[0]
    B = h0_ref.shape[1]
    S = SB // B

    # ---------------- hoisted, loop-invariant work ----------------
    # Fused embedding gather + layer-0 input projection (one MXU pass each):
    #   xproj0 = onehot(ids) @ (emb_table @ Wih0) + b0
    ids = ids_ref[...]                                              # (S*B, 1)
    lane_iota = lax.broadcasted_iota(jnp.int32, (SB, V), 1)
    onehot = (lane_iota == ids).astype(jnp.float32)                 # (S*B, V)
    emb_wih0 = jnp.dot(emb_ref[...], wih0_ref[...],
                       preferred_element_type=jnp.float32)          # (V, 4H)
    xp_sc[...] = (jnp.dot(onehot, emb_wih0,
                          preferred_element_type=jnp.float32)
                  + b0_ref[...])                                    # (S*B, 4H)

    # Weights / biases loaded once; bias broadcast done once.
    whh0 = whh0_ref[...]
    wih1 = wih1_ref[...]
    whh1 = whh1_ref[...]
    b1 = jnp.broadcast_to(b1_ref[...], (B, 4 * H))

    # Recurrent state lives in values (vregs), not scratch, during the loop.
    h1 = h0_ref[0]
    c1 = c0_ref[0]
    h2 = h0_ref[1]
    c2 = c0_ref[1]

    def activate(gates, c_prev):
        # Full-width activation on the whole (B, 4H) tile, then lane-slice.
        sig = jax.nn.sigmoid(gates)
        th = jnp.tanh(gates)
        i = sig[:, 0 * H:1 * H]
        f = sig[:, 1 * H:2 * H]
        g = th[:, 2 * H:3 * H]
        o = sig[:, 3 * H:4 * H]
        c_new = f * c_prev + i * g
        h_new = o * jnp.tanh(c_new)
        return h_new, c_new

    # Fully unrolled time loop (S is small and static) — gives the scheduler
    # visibility to overlap adjacent steps around the serial recurrence.
    for t in range(S):
        # layer 0: x-side projection already precomputed above
        g0 = xp_sc[t * B:(t + 1) * B, :] + jnp.dot(
            h1, whh0, preferred_element_type=jnp.float32)
        h1, c1 = activate(g0, c1)
        # layer 1
        g1 = (jnp.dot(h1, wih1, preferred_element_type=jnp.float32)
              + jnp.dot(h2, whh1, preferred_element_type=jnp.float32)
              + b1)
        h2, c2 = activate(g1, c2)
        hs_sc[t * B:(t + 1) * B, :] = h2

    # Hoisted output projection: one (S*B,H)@(H,V) matmul, dense writeback.
    logits_ref[...] = (jnp.dot(hs_sc[...], wlin_ref[...],
                               preferred_element_type=jnp.float32)
                       + blin_ref[...])

    hn_ref[0] = h1
    hn_ref[1] = h2
    cn_ref[0] = c1
    cn_ref[1] = c2


def init_params(key, vocab_size, embedding_dim, hidden_dim):
    """Deterministic PyTorch-style initialization (uniform +-1/sqrt(H))."""
    E, H, V = embedding_dim, hidden_dim, vocab_size
    ks = jax.random.split(key, 12)
    k = 1.0 / jnp.sqrt(jnp.float32(H))

    def u(key, shape):
        return jax.random.uniform(key, shape, jnp.float32, -k, k)

    emb = jax.random.normal(ks[0], (V, E), jnp.float32)      # nn.Embedding ~ N(0,1)

    # nn.LSTM weights: (4H, in) with gate order [i, f, g, o]; pre-transpose.
    wih0 = u(ks[1], (4 * H, E)).T                             # (E, 4H)
    whh0 = u(ks[2], (4 * H, H)).T                             # (H, 4H)
    b0 = (u(ks[3], (4 * H,)) + u(ks[4], (4 * H,))).reshape(1, 4 * H)
    wih1 = u(ks[5], (4 * H, H)).T                             # (H, 4H)
    whh1 = u(ks[6], (4 * H, H)).T                             # (H, 4H)
    b1 = (u(ks[7], (4 * H,)) + u(ks[8], (4 * H,))).reshape(1, 4 * H)

    wlin = u(ks[9], (V, H)).T                                 # (H, V)
    blin = u(ks[10], (V,)).reshape(1, V)

    return dict(emb=emb, wih0=wih0, whh0=whh0, b0=b0,
                wih1=wih1, whh1=whh1, b1=b1, wlin=wlin, blin=blin)


def net_forward(x, params, hidden=None):
    """Equivalent of Net.forward: returns (logits (S*B, V), (h_n, c_n))."""
    seq_len, batch = x.shape
    H = params["whh0"].shape[0]
    V, E = params["emb"].shape

    if hidden is None:
        h_0 = jnp.zeros((2, batch, H), jnp.float32)
        c_0 = jnp.zeros((2, batch, H), jnp.float32)
    else:
        h_0, c_0 = hidden

    ids = x.reshape(seq_len * batch, 1).astype(jnp.int32)

    out_shapes = (
        jax.ShapeDtypeStruct((seq_len * batch, V), jnp.float32),
        jax.ShapeDtypeStruct((2, batch, H), jnp.float32),
        jax.ShapeDtypeStruct((2, batch, H), jnp.float32),
    )

    logits, h_n, c_n = pl.pallas_call(
        _lstm_net_kernel,
        out_shape=out_shapes,
        # No grid: all arrays are small enough to live entirely in VMEM; the
        # sequential time recurrence is a fully-unrolled loop inside the kernel.
        scratch_shapes=[
            pltpu.VMEM((seq_len * batch, H), jnp.float32),       # per-step h2
            pltpu.VMEM((seq_len * batch, 4 * H), jnp.float32),   # hoisted xproj0
        ],
    )(ids, params["emb"],
      params["wih0"], params["whh0"], params["b0"],
      params["wih1"], params["whh1"], params["b1"],
      params["wlin"], params["blin"], h_0, c_0)

    return logits, (h_n, c_n)


def reference_forward(x, params, hidden=None):
    """Pure-JAX reference (mirrors torch.nn.LSTM semantics) for checking."""
    S, B = x.shape
    H = params["whh0"].shape[0]
    V = params["emb"].shape[0]
    if hidden is None:
        h = jnp.zeros((2, B, H), jnp.float32)
        c = jnp.zeros((2, B, H), jnp.float32)
    else:
        h, c = hidden
    emb = jnp.take(params["emb"], x, axis=0)

    def cell(x_t, h_prev, c_prev, wih, whh, b):
        gates = x_t @ wih + h_prev @ whh + b
        i, f, g, o = jnp.split(gates, 4, axis=-1)
        c_new = jax.nn.sigmoid(f) * c_prev + jax.nn.sigmoid(i) * jnp.tanh(g)
        return jax.nn.sigmoid(o) * jnp.tanh(c_new), c_new

    def step(carry, x_t):
        h, c = carry
        h1, c1 = cell(x_t, h[0], c[0], params["wih0"], params["whh0"], params["b0"])
        h2, c2 = cell(h1, h[1], c[1], params["wih1"], params["whh1"], params["b1"])
        return (jnp.stack([h1, h2]), jnp.stack([c1, c2])), h2

    (h, c), ys = lax.scan(step, (h, c), emb)
    logits = ys.reshape(S * B, H) @ params["wlin"] + params["blin"]
    return logits, (h, c)


if __name__ == "__main__":
    vocab_size, embedding_dim, hidden_dim = 128, 32, 32
    seq_len, batch = 8, 2

    key = jax.random.PRNGKey(0)
    k_x, k_p = jax.random.split(key)
    x = jax.random.randint(k_x, (seq_len, batch), 0, vocab_size, dtype=jnp.int32)
    params = init_params(k_p, vocab_size, embedding_dim, hidden_dim)

    logits, (h_n, c_n) = net_forward(x, params)
    jax.block_until_ready((logits, h_n, c_n))

    ref_logits, (ref_h, ref_c) = reference_forward(x, params)
    assert logits.shape == (seq_len * batch, vocab_size)
    assert h_n.shape == (2, batch, hidden_dim) and c_n.shape == (2, batch, hidden_dim)
    assert jnp.allclose(logits, ref_logits, atol=1e-4, rtol=1e-4)
    assert jnp.allclose(h_n, ref_h, atol=1e-4, rtol=1e-4)
    assert jnp.allclose(c_n, ref_c, atol=1e-4, rtol=1e-4)

    print("KERNEL_OK")
</pallas_src>

<mosaic_0001>
module attributes {stable_mosaic.version = 11 : i64} {
  func.func @_lstm_net_kernel(%arg0: memref<16x1xi32, #tpu.memory_space<vmem>>, %arg1: memref<128x32xf32, #tpu.memory_space<vmem>>, %arg2: memref<32x128xf32, #tpu.memory_space<vmem>>, %arg3: memref<32x128xf32, #tpu.memory_space<vmem>>, %arg4: memref<1x128xf32, #tpu.memory_space<vmem>>, %arg5: memref<32x128xf32, #tpu.memory_space<vmem>>, %arg6: memref<32x128xf32, #tpu.memory_space<vmem>>, %arg7: memref<1x128xf32, #tpu.memory_space<vmem>>, %arg8: memref<32x128xf32, #tpu.memory_space<vmem>>, %arg9: memref<1x128xf32, #tpu.memory_space<vmem>>, %arg10: memref<2x2x32xf32, #tpu.memory_space<vmem>>, %arg11: memref<2x2x32xf32, #tpu.memory_space<vmem>>, %arg12: memref<16x128xf32, #tpu.memory_space<vmem>>, %arg13: memref<2x2x32xf32, #tpu.memory_space<vmem>>, %arg14: memref<2x2x32xf32, #tpu.memory_space<vmem>>, %arg15: memref<16x32xf32, #tpu.memory_space<vmem>>, %arg16: memref<16x128xf32, #tpu.memory_space<vmem>>) attributes {dimension_semantics = [], scalar_prefetch = 0 : i64, scratch_operands = 2 : i64, tpu.core_type = #tpu.core_type<tc>} {
    %c0 = arith.constant 0 : index
    %c0_0 = arith.constant 0 : index
    %0 = vector.load %arg0[%c0, %c0_0] : memref<16x1xi32, #tpu.memory_space<vmem>>, vector<16x1xi32>
    %1 = tpu.iota {dimensions = array<i32: 1>} : vector<16x128xi32>
    %2 = vector.broadcast %0 : vector<16x1xi32> to vector<16x128xi32>
    %3 = arith.cmpi eq, %1, %2 : vector<16x128xi32>
    %4 = arith.extui %3 : vector<16x128xi1> to vector<16x128xi32>
    %5 = arith.sitofp %4 : vector<16x128xi32> to vector<16x128xf32>
    %c0_1 = arith.constant 0 : index
    %c0_2 = arith.constant 0 : index
    %6 = vector.load %arg1[%c0_1, %c0_2] : memref<128x32xf32, #tpu.memory_space<vmem>>, vector<128x32xf32>
    %c0_3 = arith.constant 0 : index
    %c0_4 = arith.constant 0 : index
    %7 = vector.load %arg2[%c0_3, %c0_4] : memref<32x128xf32, #tpu.memory_space<vmem>>, vector<32x128xf32>
    %cst = arith.constant dense<0.000000e+00> : vector<128x128xf32>
    %8 = tpu.matmul %6, %7, %cst {dimension_numbers = #tpu.dot_dimension_numbers<[1], [0], [0], [1], [0, 0, 1, 1], [], []>} : vector<128x32xf32>, vector<32x128xf32>, vector<128x128xf32> -> vector<128x128xf32>
    %cst_5 = arith.constant dense<0.000000e+00> : vector<16x128xf32>
    %9 = tpu.matmul %5, %8, %cst_5 {dimension_numbers = #tpu.dot_dimension_numbers<[1], [0], [0], [1], [0, 0, 1, 1], [], []>} : vector<16x128xf32>, vector<128x128xf32>, vector<16x128xf32> -> vector<16x128xf32>
    %c0_6 = arith.constant 0 : index
    %c0_7 = arith.constant 0 : index
    %10 = vector.load %arg4[%c0_6, %c0_7] : memref<1x128xf32, #tpu.memory_space<vmem>>, vector<1x128xf32>
    %11 = vector.broadcast %10 : vector<1x128xf32> to vector<16x128xf32>
    %12 = arith.addf %9, %11 : vector<16x128xf32>
    %c0_8 = arith.constant 0 : index
    %c0_9 = arith.constant 0 : index
    %13 = vector.load %arg16[%c0_8, %c0_9] : memref<16x128xf32, #tpu.memory_space<vmem>>, vector<16x128xf32>
    tpu.vector_store %arg16[%c0_8, %c0_9], %12 {strides = array<i32>} : memref<16x128xf32, #tpu.memory_space<vmem>>, vector<16x128xf32>,
    %c0_10 = arith.constant 0 : index
    %c0_11 = arith.constant 0 : index
    %14 = vector.load %arg3[%c0_10, %c0_11] : memref<32x128xf32, #tpu.memory_space<vmem>>, vector<32x128xf32>
    %c0_12 = arith.constant 0 : index
    %c0_13 = arith.constant 0 : index
    %15 = vector.load %arg5[%c0_12, %c0_13] : memref<32x128xf32, #tpu.memory_space<vmem>>, vector<32x128xf32>
    %c0_14 = arith.constant 0 : index
    %c0_15 = arith.constant 0 : index
    %16 = vector.load %arg6[%c0_14, %c0_15] : memref<32x128xf32, #tpu.memory_space<vmem>>, vector<32x128xf32>
    %c0_16 = arith.constant 0 : index
    %c0_17 = arith.constant 0 : index
    %17 = vector.load %arg7[%c0_16, %c0_17] : memref<1x128xf32, #tpu.memory_space<vmem>>, vector<1x128xf32>
    %18 = vector.shape_cast %17 : vector<1x128xf32> to vector<1x128xf32>
    %19 = vector.broadcast %18 : vector<1x128xf32> to vector<2x128xf32>
    %c0_18 = arith.constant 0 : index
    %c0_19 = arith.constant 0 : index
    %c0_20 = arith.constant 0 : index
    %20 = vector.load %arg10[%c0_18, %c0_19, %c0_20] : memref<2x2x32xf32, #tpu.memory_space<vmem>>, vector<1x2x32xf32>
    %21 = vector.shape_cast %20 : vector<1x2x32xf32> to vector<2x32xf32>
    %c0_21 = arith.constant 0 : index
    %c0_22 = arith.constant 0 : index
    %c0_23 = arith.constant 0 : index
    %22 = vector.load %arg11[%c0_21, %c0_22, %c0_23] : memref<2x2x32xf32, #tpu.memory_space<vmem>>, vector<1x2x32xf32>
    %23 = vector.shape_cast %22 : vector<1x2x32xf32> to vector<2x32xf32>
    %c1 = arith.constant 1 : index
    %c0_24 = arith.constant 0 : index
    %c0_25 = arith.constant 0 : index
    %24 = vector.load %arg10[%c1, %c0_24, %c0_25] : memref<2x2x32xf32, #tpu.memory_space<vmem>>, vector<1x2x32xf32>
    %25 = vector.shape_cast %24 : vector<1x2x32xf32> to vector<2x32xf32>
    %c1_26 = arith.constant 1 : index
    %c0_27 = arith.constant 0 : index
    %c0_28 = arith.constant 0 : index
    %26 = vector.load %arg11[%c1_26, %c0_27, %c0_28] : memref<2x2x32xf32, #tpu.memory_space<vmem>>, vector<1x2x32xf32>
    %27 = vector.shape_cast %26 : vector<1x2x32xf32> to vector<2x32xf32>
    %c0_29 = arith.constant 0 : index
    %c0_30 = arith.constant 0 : index
    %28 = vector.load %arg16[%c0_29, %c0_30] : memref<16x128xf32, #tpu.memory_space<vmem>>, vector<2x128xf32>
    %cst_31 = arith.constant dense<0.000000e+00> : vector<2x128xf32>
    %29 = tpu.matmul %21, %14, %cst_31 {dimension_numbers = #tpu.dot_dimension_numbers<[1], [0], [0], [1], [0, 0, 1, 1], [], []>} : vector<2x32xf32>, vector<32x128xf32>, vector<2x128xf32> -> vector<2x128xf32>
    %30 = arith.addf %28, %29 : vector<2x128xf32>
    %31 = arith.negf %30 : vector<2x128xf32>
    %32 = math.exp %31 : vector<2x128xf32>
    %cst_32 = arith.constant 1.000000e+00 : f32
    %33 = vector.broadcast %cst_32 : f32 to vector<2x128xf32>
    %34 = arith.addf %33, %32 : vector<2x128xf32>
    %35 = arith.divf %33, %34 : vector<2x128xf32>
    %36 = math.tanh %30 : vector<2x128xf32>
    %37 = vector.extract_strided_slice %35 {offsets = [0, 0], sizes = [2, 32], strides = [1, 1]} : vector<2x128xf32> to vector<2x32xf32>
    %38 = vector.extract_strided_slice %35 {offsets = [0, 32], sizes = [2, 32], strides = [1, 1]} : vector<2x128xf32> to vector<2x32xf32>
    %39 = vector.extract_strided_slice %36 {offsets = [0, 64], sizes = [2, 32], strides = [1, 1]} : vector<2x128xf32> to vector<2x32xf32>
    %40 = vector.extract_strided_slice %35 {offsets = [0, 96], sizes = [2, 32], strides = [1, 1]} : vector<2x128xf32> to vector<2x32xf32>
    %41 = arith.mulf %38, %23 : vector<2x32xf32>
    %42 = arith.mulf %37, %39 : vector<2x32xf32>
    %43 = arith.addf %41, %42 : vector<2x32xf32>
    %44 = math.tanh %43 : vector<2x32xf32>
    %45 = arith.mulf %40, %44 : vector<2x32xf32>
    %cst_33 = arith.constant dense<0.000000e+00> : vector<2x128xf32>
    %46 = tpu.matmul %45, %15, %cst_33 {dimension_numbers = #tpu.dot_dimension_numbers<[1], [0], [0], [1], [0, 0, 1, 1], [], []>} : vector<2x32xf32>, vector<32x128xf32>, vector<2x128xf32> -> vector<2x128xf32>
    %cst_34 = arith.constant dense<0.000000e+00> : vector<2x128xf32>
    %47 = tpu.matmul %25, %16, %cst_34 {dimension_numbers = #tpu.dot_dimension_numbers<[1], [0], [0], [1], [0, 0, 1, 1], [], []>} : vector<2x32xf32>, vector<32x128xf32>, vector<2x128xf32> -> vector<2x128xf32>
    %48 = arith.addf %46, %47 : vector<2x128xf32>
    %49 = arith.addf %48, %19 : vector<2x128xf32>
    %50 = arith.negf %49 : vector<2x128xf32>
    %51 = math.exp %50 : vector<2x128xf32>
    %cst_35 = arith.constant 1.000000e+00 : f32
    %52 = vector.broadcast %cst_35 : f32 to vector<2x128xf32>
    %53 = arith.addf %52, %51 : vector<2x128xf32>
    %54 = arith.divf %52, %53 : vector<2x128xf32>
    %55 = math.tanh %49 : vector<2x128xf32>
    %56 = vector.extract_strided_slice %54 {offsets = [0, 0], sizes = [2, 32], strides = [1, 1]} : vector<2x128xf32> to vector<2x32xf32>
    %57 = vector.extract_strided_slice %54 {offsets = [0, 32], sizes = [2, 32], strides = [1, 1]} : vector<2x128xf32> to vector<2x32xf32>
    %58 = vector.extract_strided_slice %55 {offsets = [0, 64], sizes = [2, 32], strides = [1, 1]} : vector<2x128xf32> to vector<2x32xf32>
    %59 = vector.extract_strided_slice %54 {offsets = [0, 96], sizes = [2, 32], strides = [1, 1]} : vector<2x128xf32> to vector<2x32xf32>
    %60 = arith.mulf %57, %27 : vector<2x32xf32>
    %61 = arith.mulf %56, %58 : vector<2x32xf32>
    %62 = arith.addf %60, %61 : vector<2x32xf32>
    %63 = math.tanh %62 : vector<2x32xf32>
    %64 = arith.mulf %59, %63 : vector<2x32xf32>
    %c0_36 = arith.constant 0 : index
    %c0_37 = arith.constant 0 : index
    %65 = vector.load %arg15[%c0_36, %c0_37] : memref<16x32xf32, #tpu.memory_space<vmem>>, vector<2x32xf32>
    tpu.vector_store %arg15[%c0_36, %c0_37], %64 {strides = array<i32>} : memref<16x32xf32, #tpu.memory_space<vmem>>, vector<2x32xf32>,
    %c2 = arith.constant 2 : index
    %c0_38 = arith.constant 0 : index
    %66 = vector.load %arg16[%c2, %c0_38] : memref<16x128xf32, #tpu.memory_space<vmem>>, vector<2x128xf32>
    %cst_39 = arith.constant dense<0.000000e+00> : vector<2x128xf32>
    %67 = tpu.matmul %45, %14, %cst_39 {dimension_numbers = #tpu.dot_dimension_numbers<[1], [0], [0], [1], [0, 0, 1, 1], [], []>} : vector<2x32xf32>, vector<32x128xf32>, vector<2x128xf32> -> vector<2x128xf32>
    %68 = arith.addf %66, %67 : vector<2x128xf32>
    %69 = arith.negf %68 : vector<2x128xf32>
    %70 = math.exp %69 : vector<2x128xf32>
    %cst_40 = arith.constant 1.000000e+00 : f32
    %71 = vector.broadcast %cst_40 : f32 to vector<2x128xf32>
    %72 = arith.addf %71, %70 : vector<2x128xf32>
    %73 = arith.divf %71, %72 : vector<2x128xf32>
    %74 = math.tanh %68 : vector<2x128xf32>
    %75 = vector.extract_strided_slice %73 {offsets = [0, 0], sizes = [2, 32], strides = [1, 1]} : vector<2x128xf32> to vector<2x32xf32>
    %76 = vector.extract_strided_slice %73 {offsets = [0, 32], sizes = [2, 32], strides = [1, 1]} : vector<2x128xf32> to vector<2x32xf32>
    %77 = vector.extract_strided_slice %74 {offsets = [0, 64], sizes = [2, 32], strides = [1, 1]} : vector<2x128xf32> to vector<2x32xf32>
    %78 = vector.extract_strided_slice %73 {offsets = [0, 96], sizes = [2, 32], strides = [1, 1]} : vector<2x128xf32> to vector<2x32xf32>
    %79 = arith.mulf %76, %43 : vector<2x32xf32>
    %80 = arith.mulf %75, %77 : vector<2x32xf32>
    %81 = arith.addf %79, %80 : vector<2x32xf32>
    %82 = math.tanh %81 : vector<2x32xf32>
    %83 = arith.mulf %78, %82 : vector<2x32xf32>
    %cst_41 = arith.constant dense<0.000000e+00> : vector<2x128xf32>
    %84 = tpu.matmul %83, %15, %cst_41 {dimension_numbers = #tpu.dot_dimension_numbers<[1], [0], [0], [1], [0, 0, 1, 1], [], []>} : vector<2x32xf32>, vector<32x128xf32>, vector<2x128xf32> -> vector<2x128xf32>
    %cst_42 = arith.constant dense<0.000000e+00> : vector<2x128xf32>
    %85 = tpu.matmul %64, %16, %cst_42 {dimension_numbers = #tpu.dot_dimension_numbers<[1], [0], [0], [1], [0, 0, 1, 1], [], []>} : vector<2x32xf32>, vector<32x128xf32>, vector<2x128xf32> -> vector<2x128xf32>
    %86 = arith.addf %84, %85 : vector<2x128xf32>
    %87 = arith.addf %86, %19 : vector<2x128xf32>
    %88 = arith.negf %87 : vector<2x128xf32>
    %89 = math.exp %88 : vector<2x128xf32>
    %cst_43 = arith.constant 1.000000e+00 : f32
    %90 = vector.broadcast %cst_43 : f32 to vector<2x128xf32>
    %91 = arith.addf %90, %89 : vector<2x128xf32>
    %92 = arith.divf %90, %91 : vector<2x128xf32>
    %93 = math.tanh %87 : vector<2x128xf32>
    %94 = vector.extract_strided_slice %92 {offsets = [0, 0], sizes = [2, 32], strides = [1, 1]} : vector<2x128xf32> to vector<2x32xf32>
    %95 = vector.extract_strided_slice %92 {offsets = [0, 32], sizes = [2, 32], strides = [1, 1]} : vector<2x128xf32> to vector<2x32xf32>
    %96 = vector.extract_strided_slice %93 {offsets = [0, 64], sizes = [2, 32], strides = [1, 1]} : vector<2x128xf32> to vector<2x32xf32>
    %97 = vector.extract_strided_slice %92 {offsets = [0, 96], sizes = [2, 32], strides = [1, 1]} : vector<2x128xf32> to vector<2x32xf32>
    %98 = arith.mulf %95, %62 : vector<2x32xf32>
    %99 = arith.mulf %94, %96 : vector<2x32xf32>
    %100 = arith.addf %98, %99 : vector<2x32xf32>
    %101 = math.tanh %100 : vector<2x32xf32>
    %102 = arith.mulf %97, %101 : vector<2x32xf32>
    %c2_44 = arith.constant 2 : index
    %c0_45 = arith.constant 0 : index
    %103 = vector.load %arg15[%c2_44, %c0_45] : memref<16x32xf32, #tpu.memory_space<vmem>>, vector<2x32xf32>
    tpu.vector_store %arg15[%c2_44, %c0_45], %102 {strides = array<i32>} : memref<16x32xf32, #tpu.memory_space<vmem>>, vector<2x32xf32>,
    %c4 = arith.constant 4 : index
    %c0_46 = arith.constant 0 : index
    %104 = vector.load %arg16[%c4, %c0_46] : memref<16x128xf32, #tpu.memory_space<vmem>>, vector<2x128xf32>
    %cst_47 = arith.constant dense<0.000000e+00> : vector<2x128xf32>
    %105 = tpu.matmul %83, %14, %cst_47 {dimension_numbers = #tpu.dot_dimension_numbers<[1], [0], [0], [1], [0, 0, 1, 1], [], []>} : vector<2x32xf32>, vector<32x128xf32>, vector<2x128xf32> -> vector<2x128xf32>
    %106 = arith.addf %104, %105 : vector<2x128xf32>
    %107 = arith.negf %106 : vector<2x128xf32>
    %108 = math.exp %107 : vector<2x128xf32>
    %cst_48 = arith.constant 1.000000e+00 : f32
    %109 = vector.broadcast %cst_48 : f32 to vector<2x128xf32>
    %110 = arith.addf %109, %108 : vector<2x128xf32>
    %111 = arith.divf %109, %110 : vector<2x128xf32>
    %112 = math.tanh %106 : vector<2x128xf32>
    %113 = vector.extract_strided_slice %111 {offsets = [0, 0], sizes = [2, 32], strides = [1, 1]} : vector<2x128xf32> to vector<2x32xf32>
    %114 = vector.extract_strided_slice %111 {offsets = [0, 32], sizes = [2, 32], strides = [1, 1]} : vector<2x128xf32> to vector<2x32xf32>
    %115 = vector.extract_strided_slice %112 {offsets = [0, 64], sizes = [2, 32], strides = [1, 1]} : vector<2x128xf32> to vector<2x32xf32>
    %116 = vector.extract_strided_slice %111 {offsets = [0, 96], sizes = [2, 32], strides = [1, 1]} : vector<2x128xf32> to vector<2x32xf32>
    %117 = arith.mulf %114, %81 : vector<2x32xf32>
    %118 = arith.mulf %113, %115 : vector<2x32xf32>
    %119 = arith.addf %117, %118 : vector<2x32xf32>
    %120 = math.tanh %119 : vector<2x32xf32>
    %121 = arith.mulf %116, %120 : vector<2x32xf32>
    %cst_49 = arith.constant dense<0.000000e+00> : vector<2x128xf32>
    %122 = tpu.matmul %121, %15, %cst_49 {dimension_numbers = #tpu.dot_dimension_numbers<[1], [0], [0], [1], [0, 0, 1, 1], [], []>} : vector<2x32xf32>, vector<32x128xf32>, vector<2x128xf32> -> vector<2x128xf32>
    %cst_50 = arith.constant dense<0.000000e+00> : vector<2x128xf32>
    %123 = tpu.matmul %102, %16, %cst_50 {dimension_numbers = #tpu.dot_dimension_numbers<[1], [0], [0], [1], [0, 0, 1, 1], [], []>} : vector<2x32xf32>, vector<32x128xf32>, vector<2x128xf32> -> vector<2x128xf32>
    %124 = arith.addf %122, %123 : vector<2x128xf32>
    %125 = arith.addf %124, %19 : vector<2x128xf32>
    %126 = arith.negf %125 : vector<2x128xf32>
    %127 = math.exp %126 : vector<2x128xf32>
    %cst_51 = arith.constant 1.000000e+00 : f32
    %128 = vector.broadcast %cst_51 : f32 to vector<2x128xf32>
    %129 = arith.addf %128, %127 : vector<2x128xf32>
    %130 = arith.divf %128, %129 : vector<2x128xf32>
    %131 = math.tanh %125 : vector<2x128xf32>
    %132 = vector.extract_strided_slice %130 {offsets = [0, 0], sizes = [2, 32], strides = [1, 1]} : vector<2x128xf32> to vector<2x32xf32>
    %133 = vector.extract_strided_slice %130 {offsets = [0, 32], sizes = [2, 32], strides = [1, 1]} : vector<2x128xf32> to vector<2x32xf32>
    %134 = vector.extract_strided_slice %131 {offsets = [0, 64], sizes = [2, 32], strides = [1, 1]} : vector<2x128xf32> to vector<2x32xf32>
    %135 = vector.extract_strided_slice %130 {offsets = [0, 96], sizes = [2, 32], strides = [1, 1]} : vector<2x128xf32> to vector<2x32xf32>
    %136 = arith.mulf %133, %100 : vector<2x32xf32>
    %137 = arith.mulf %132, %134 : vector<2x32xf32>
    %138 = arith.addf %136, %137 : vector<2x32xf32>
    %139 = math.tanh %138 : vector<2x32xf32>
    %140 = arith.mulf %135, %139 : vector<2x32xf32>
    %c4_52 = arith.constant 4 : index
    %c0_53 = arith.constant 0 : index
    %141 = vector.load %arg15[%c4_52, %c0_53] : memref<16x32xf32, #tpu.memory_space<vmem>>, vector<2x32xf32>
    tpu.vector_store %arg15[%c4_52, %c0_53], %140 {strides = array<i32>} : memref<16x32xf32, #tpu.memory_space<vmem>>, vector<2x32xf32>,
    %c6 = arith.constant 6 : index
    %c0_54 = arith.constant 0 : index
    %142 = vector.load %arg16[%c6, %c0_54] : memref<16x128xf32, #tpu.memory_space<vmem>>, vector<2x128xf32>
    %cst_55 = arith.constant dense<0.000000e+00> : vector<2x128xf32>
    %143 = tpu.matmul %121, %14, %cst_55 {dimension_numbers = #tpu.dot_dimension_numbers<[1], [0], [0], [1], [0, 0, 1, 1], [], []>} : vector<2x32xf32>, vector<32x128xf32>, vector<2x128xf32> -> vector<2x128xf32>
    %144 = arith.addf %142, %143 : vector<2x128xf32>
    %145 = arith.negf %144 : vector<2x128xf32>
    %146 = math.exp %145 : vector<2x128xf32>
    %cst_56 = arith.constant 1.000000e+00 : f32
    %147 = vector.broadcast %cst_56 : f32 to vector<2x128xf32>
    %148 = arith.addf %147, %146 : vector<2x128xf32>
    %149 = arith.divf %147, %148 : vector<2x128xf32>
    %150 = math.tanh %144 : vector<2x128xf32>
    %151 = vector.extract_strided_slice %149 {offsets = [0, 0], sizes = [2, 32], strides = [1, 1]} : vector<2x128xf32> to vector<2x32xf32>
    %152 = vector.extract_strided_slice %149 {offsets = [0, 32], sizes = [2, 32], strides = [1, 1]} : vector<2x128xf32> to vector<2x32xf32>
    %153 = vector.extract_strided_slice %150 {offsets = [0, 64], sizes = [2, 32], strides = [1, 1]} : vector<2x128xf32> to vector<2x32xf32>
    %154 = vector.extract_strided_slice %149 {offsets = [0, 96], sizes = [2, 32], strides = [1, 1]} : vector<2x128xf32> to vector<2x32xf32>
    %155 = arith.mulf %152, %119 : vector<2x32xf32>
    %156 = arith.mulf %151, %153 : vector<2x32xf32>
    %157 = arith.addf %155, %156 : vector<2x32xf32>
    %158 = math.tanh %157 : vector<2x32xf32>
    %159 = arith.mulf %154, %158 : vector<2x32xf32>
    %cst_57 = arith.constant dense<0.000000e+00> : vector<2x128xf32>
    %160 = tpu.matmul %159, %15, %cst_57 {dimension_numbers = #tpu.dot_dimension_numbers<[1], [0], [0], [1], [0, 0, 1, 1], [], []>} : vector<2x32xf32>, vector<32x128xf32>, vector<2x128xf32> -> vector<2x128xf32>
    %cst_58 = arith.constant dense<0.000000e+00> : vector<2x128xf32>
    %161 = tpu.matmul %140, %16, %cst_58 {dimension_numbers = #tpu.dot_dimension_numbers<[1], [0], [0], [1], [0, 0, 1, 1], [], []>} : vector<2x32xf32>, vector<32x128xf32>, vector<2x128xf32> -> vector<2x128xf32>
    %162 = arith.addf %160, %161 : vector<2x128xf32>
    %163 = arith.addf %162, %19 : vector<2x128xf32>
    %164 = arith.negf %163 : vector<2x128xf32>
    %165 = math.exp %164 : vector<2x128xf32>
    %cst_59 = arith.constant 1.000000e+00 : f32
    %166 = vector.broadcast %cst_59 : f32 to vector<2x128xf32>
    %167 = arith.addf %166, %165 : vector<2x128xf32>
    %168 = arith.divf %166, %167 : vector<2x128xf32>
    %169 = math.tanh %163 : vector<2x128xf32>
    %170 = vector.extract_strided_slice %168 {offsets = [0, 0], sizes = [2, 32], strides = [1, 1]} : vector<2x128xf32> to vector<2x32xf32>
    %171 = vector.extract_strided_slice %168 {offsets = [0, 32], sizes = [2, 32], strides = [1, 1]} : vector<2x128xf32> to vector<2x32xf32>
    %172 = vector.extract_strided_slice %169 {offsets = [0, 64], sizes = [2, 32], strides = [1, 1]} : vector<2x128xf32> to vector<2x32xf32>
    %173 = vector.extract_strided_slice %168 {offsets = [0, 96], sizes = [2, 32], strides = [1, 1]} : vector<2x128xf32> to vector<2x32xf32>
    %174 = arith.mulf %171, %138 : vector<2x32xf32>
    %175 = arith.mulf %170, %172 : vector<2x32xf32>
    %176 = arith.addf %174, %175 : vector<2x32xf32>
    %177 = math.tanh %176 : vector<2x32xf32>
    %178 = arith.mulf %173, %177 : vector<2x32xf32>
    %c6_60 = arith.constant 6 : index
    %c0_61 = arith.constant 0 : index
    %179 = vector.load %arg15[%c6_60, %c0_61] : memref<16x32xf32, #tpu.memory_space<vmem>>, vector<2x32xf32>
    tpu.vector_store %arg15[%c6_60, %c0_61], %178 {strides = array<i32>} : memref<16x32xf32, #tpu.memory_space<vmem>>, vector<2x32xf32>,
    %c8 = arith.constant 8 : index
    %c0_62 = arith.constant 0 : index
    %180 = vector.load %arg16[%c8, %c0_62] : memref<16x128xf32, #tpu.memory_space<vmem>>, vector<2x128xf32>
    %cst_63 = arith.constant dense<0.000000e+00> : vector<2x128xf32>
    %181 = tpu.matmul %159, %14, %cst_63 {dimension_numbers = #tpu.dot_dimension_numbers<[1], [0], [0], [1], [0, 0, 1, 1], [], []>} : vector<2x32xf32>, vector<32x128xf32>, vector<2x128xf32> -> vector<2x128xf32>
    %182 = arith.addf %180, %181 : vector<2x128xf32>
    %183 = arith.negf %182 : vector<2x128xf32>
    %184 = math.exp %183 : vector<2x128xf32>
    %cst_64 = arith.constant 1.000000e+00 : f32
    %185 = vector.broadcast %cst_64 : f32 to vector<2x128xf32>
    %186 = arith.addf %185, %184 : vector<2x128xf32>
    %187 = arith.divf %185, %186 : vector<2x128xf32>
    %188 = math.tanh %182 : vector<2x128xf32>
    %189 = vector.extract_strided_slice %187 {offsets = [0, 0], sizes = [2, 32], strides = [1, 1]} : vector<2x128xf32> to vector<2x32xf32>
    %190 = vector.extract_strided_slice %187 {offsets = [0, 32], sizes = [2, 32], strides = [1, 1]} : vector<2x128xf32> to vector<2x32xf32>
    %191 = vector.extract_strided_slice %188 {offsets = [0, 64], sizes = [2, 32], strides = [1, 1]} : vector<2x128xf32> to vector<2x32xf32>
    %192 = vector.extract_strided_slice %187 {offsets = [0, 96], sizes = [2, 32], strides = [1, 1]} : vector<2x128xf32> to vector<2x32xf32>
    %193 = arith.mulf %190, %157 : vector<2x32xf32>
    %194 = arith.mulf %189, %191 : vector<2x32xf32>
    %195 = arith.addf %193, %194 : vector<2x32xf32>
    %196 = math.tanh %195 : vector<2x32xf32>
    %197 = arith.mulf %192, %196 : vector<2x32xf32>
    %cst_65 = arith.constant dense<0.000000e+00> : vector<2x128xf32>
    %198 = tpu.matmul %197, %15, %cst_65 {dimension_numbers = #tpu.dot_dimension_numbers<[1], [0], [0], [1], [0, 0, 1, 1], [], []>} : vector<2x32xf32>, vector<32x128xf32>, vector<2x128xf32> -> vector<2x128xf32>
    %cst_66 = arith.constant dense<0.000000e+00> : vector<2x128xf32>
    %199 = tpu.matmul %178, %16, %cst_66 {dimension_numbers = #tpu.dot_dimension_numbers<[1], [0], [0], [1], [0, 0, 1, 1], [], []>} : vector<2x32xf32>, vector<32x128xf32>, vector<2x128xf32> -> vector<2x128xf32>
    %200 = arith.addf %198, %199 : vector<2x128xf32>
    %201 = arith.addf %200, %19 : vector<2x128xf32>
    %202 = arith.negf %201 : vector<2x128xf32>
    %203 = math.exp %202 : vector<2x128xf32>
    %cst_67 = arith.constant 1.000000e+00 : f32
    %204 = vector.broadcast %cst_67 : f32 to vector<2x128xf32>
    %205 = arith.addf %204, %203 : vector<2x128xf32>
    %206 = arith.divf %204, %205 : vector<2x128xf32>
    %207 = math.tanh %201 : vector<2x128xf32>
    %208 = vector.extract_strided_slice %206 {offsets = [0, 0], sizes = [2, 32], strides = [1, 1]} : vector<2x128xf32> to vector<2x32xf32>
    %209 = vector.extract_strided_slice %206 {offsets = [0, 32], sizes = [2, 32], strides = [1, 1]} : vector<2x128xf32> to vector<2x32xf32>
    %210 = vector.extract_strided_slice %207 {offsets = [0, 64], sizes = [2, 32], strides = [1, 1]} : vector<2x128xf32> to vector<2x32xf32>
    %211 = vector.extract_strided_slice %206 {offsets = [0, 96], sizes = [2, 32], strides = [1, 1]} : vector<2x128xf32> to vector<2x32xf32>
    %212 = arith.mulf %209, %176 : vector<2x32xf32>
    %213 = arith.mulf %208, %210 : vector<2x32xf32>
    %214 = arith.addf %212, %213 : vector<2x32xf32>
    %215 = math.tanh %214 : vector<2x32xf32>
    %216 = arith.mulf %211, %215 : vector<2x32xf32>
    %c8_68 = arith.constant 8 : index
    %c0_69 = arith.constant 0 : index
    %217 = vector.load %arg15[%c8_68, %c0_69] : memref<16x32xf32, #tpu.memory_space<vmem>>, vector<2x32xf32>
    tpu.vector_store %arg15[%c8_68, %c0_69], %216 {strides = array<i32>} : memref<16x32xf32, #tpu.memory_space<vmem>>, vector<2x32xf32>,
    %c10 = arith.constant 10 : index
    %c0_70 = arith.constant 0 : index
    %218 = vector.load %arg16[%c10, %c0_70] : memref<16x128xf32, #tpu.memory_space<vmem>>, vector<2x128xf32>
    %cst_71 = arith.constant dense<0.000000e+00> : vector<2x128xf32>
    %219 = tpu.matmul %197, %14, %cst_71 {dimension_numbers = #tpu.dot_dimension_numbers<[1], [0], [0], [1], [0, 0, 1, 1], [], []>} : vector<2x32xf32>, vector<32x128xf32>, vector<2x128xf32> -> vector<2x128xf32>
    %220 = arith.addf %218, %219 : vector<2x128xf32>
    %221 = arith.negf %220 : vector<2x128xf32>
    %222 = math.exp %221 : vector<2x128xf32>
    %cst_72 = arith.constant 1.000000e+00 : f32
    %223 = vector.broadcast %cst_72 : f32 to vector<2x128xf32>
    %224 = arith.addf %223, %222 : vector<2x128xf32>
    %225 = arith.divf %223, %224 : vector<2x128xf32>
    %226 = math.tanh %220 : vector<2x128xf32>
    %227 = vector.extract_strided_slice %225 {offsets = [0, 0], sizes = [2, 32], strides = [1, 1]} : vector<2x128xf32> to vector<2x32xf32>
    %228 = vector.extract_strided_slice %225 {offsets = [0, 32], sizes = [2, 32], strides = [1, 1]} : vector<2x128xf32> to vector<2x32xf32>
    %229 = vector.extract_strided_slice %226 {offsets = [0, 64], sizes = [2, 32], strides = [1, 1]} : vector<2x128xf32> to vector<2x32xf32>
    %230 = vector.extract_strided_slice %225 {offsets = [0, 96], sizes = [2, 32], strides = [1, 1]} : vector<2x128xf32> to vector<2x32xf32>
    %231 = arith.mulf %228, %195 : vector<2x32xf32>
    %232 = arith.mulf %227, %229 : vector<2x32xf32>
    %233 = arith.addf %231, %232 : vector<2x32xf32>
    %234 = math.tanh %233 : vector<2x32xf32>
    %235 = arith.mulf %230, %234 : vector<2x32xf32>
    %cst_73 = arith.constant dense<0.000000e+00> : vector<2x128xf32>
    %236 = tpu.matmul %235, %15, %cst_73 {dimension_numbers = #tpu.dot_dimension_numbers<[1], [0], [0], [1], [0, 0, 1, 1], [], []>} : vector<2x32xf32>, vector<32x128xf32>, vector<2x128xf32> -> vector<2x128xf32>
    %cst_74 = arith.constant dense<0.000000e+00> : vector<2x128xf32>
    %237 = tpu.matmul %216, %16, %cst_74 {dimension_numbers = #tpu.dot_dimension_numbers<[1], [0], [0], [1], [0, 0, 1, 1], [], []>} : vector<2x32xf32>, vector<32x128xf32>, vector<2x128xf32> -> vector<2x128xf32>
    %238 = arith.addf %236, %237 : vector<2x128xf32>
    %239 = arith.addf %238, %19 : vector<2x128xf32>
    %240 = arith.negf %239 : vector<2x128xf32>
    %241 = math.exp %240 : vector<2x128xf32>
    %cst_75 = arith.constant 1.000000e+00 : f32
    %242 = vector.broadcast %cst_75 : f32 to vector<2x128xf32>
    %243 = arith.addf %242, %241 : vector<2x128xf32>
    %244 = arith.divf %242, %243 : vector<2x128xf32>
    %245 = math.tanh %239 : vector<2x128xf32>
    %246 = vector.extract_strided_slice %244 {offsets = [0, 0], sizes = [2, 32], strides = [1, 1]} : vector<2x128xf32> to vector<2x32xf32>
    %247 = vector.extract_strided_slice %244 {offsets = [0, 32], sizes = [2, 32], strides = [1, 1]} : vector<2x128xf32> to vector<2x32xf32>
    %248 = vector.extract_strided_slice %245 {offsets = [0, 64], sizes = [2, 32], strides = [1, 1]} : vector<2x128xf32> to vector<2x32xf32>
    %249 = vector.extract_strided_slice %244 {offsets = [0, 96], sizes = [2, 32], strides = [1, 1]} : vector<2x128xf32> to vector<2x32xf32>
    %250 = arith.mulf %247, %214 : vector<2x32xf32>
    %251 = arith.mulf %246, %248 : vector<2x32xf32>
    %252 = arith.addf %250, %251 : vector<2x32xf32>
    %253 = math.tanh %252 : vector<2x32xf32>
    %254 = arith.mulf %249, %253 : vector<2x32xf32>
    %c10_76 = arith.constant 10 : index
    %c0_77 = arith.constant 0 : index
    %255 = vector.load %arg15[%c10_76, %c0_77] : memref<16x32xf32, #tpu.memory_space<vmem>>, vector<2x32xf32>
    tpu.vector_store %arg15[%c10_76, %c0_77], %254 {strides = array<i32>} : memref<16x32xf32, #tpu.memory_space<vmem>>, vector<2x32xf32>,
    %c12 = arith.constant 12 : index
    %c0_78 = arith.constant 0 : index
    %256 = vector.load %arg16[%c12, %c0_78] : memref<16x128xf32, #tpu.memory_space<vmem>>, vector<2x128xf32>
    %cst_79 = arith.constant dense<0.000000e+00> : vector<2x128xf32>
    %257 = tpu.matmul %235, %14, %cst_79 {dimension_numbers = #tpu.dot_dimension_numbers<[1], [0], [0], [1], [0, 0, 1, 1], [], []>} : vector<2x32xf32>, vector<32x128xf32>, vector<2x128xf32> -> vector<2x128xf32>
    %258 = arith.addf %256, %257 : vector<2x128xf32>
    %259 = arith.negf %258 : vector<2x128xf32>
    %260 = math.exp %259 : vector<2x128xf32>
    %cst_80 = arith.constant 1.000000e+00 : f32
    %261 = vector.broadcast %cst_80 : f32 to vector<2x128xf32>
    %262 = arith.addf %261, %260 : vector<2x128xf32>
    %263 = arith.divf %261, %262 : vector<2x128xf32>
    %264 = math.tanh %258 : vector<2x128xf32>
    %265 = vector.extract_strided_slice %263 {offsets = [0, 0], sizes = [2, 32], strides = [1, 1]} : vector<2x128xf32> to vector<2x32xf32>
    %266 = vector.extract_strided_slice %263 {offsets = [0, 32], sizes = [2, 32], strides = [1, 1]} : vector<2x128xf32> to vector<2x32xf32>
    %267 = vector.extract_strided_slice %264 {offsets = [0, 64], sizes = [2, 32], strides = [1, 1]} : vector<2x128xf32> to vector<2x32xf32>
    %268 = vector.extract_strided_slice %263 {offsets = [0, 96], sizes = [2, 32], strides = [1, 1]} : vector<2x128xf32> to vector<2x32xf32>
    %269 = arith.mulf %266, %233 : vector<2x32xf32>
    %270 = arith.mulf %265, %267 : vector<2x32xf32>
    %271 = arith.addf %269, %270 : vector<2x32xf32>
    %272 = math.tanh %271 : vector<2x32xf32>
    %273 = arith.mulf %268, %272 : vector<2x32xf32>
    %cst_81 = arith.constant dense<0.000000e+00> : vector<2x128xf32>
    %274 = tpu.matmul %273, %15, %cst_81 {dimension_numbers = #tpu.dot_dimension_numbers<[1], [0], [0], [1], [0, 0, 1, 1], [], []>} : vector<2x32xf32>, vector<32x128xf32>, vector<2x128xf32> -> vector<2x128xf32>
    %cst_82 = arith.constant dense<0.000000e+00> : vector<2x128xf32>
    %275 = tpu.matmul %254, %16, %cst_82 {dimension_numbers = #tpu.dot_dimension_numbers<[1], [0], [0], [1], [0, 0, 1, 1], [], []>} : vector<2x32xf32>, vector<32x128xf32>, vector<2x128xf32> -> vector<2x128xf32>
    %276 = arith.addf %274, %275 : vector<2x128xf32>
    %277 = arith.addf %276, %19 : vector<2x128xf32>
    %278 = arith.negf %277 : vector<2x128xf32>
    %279 = math.exp %278 : vector<2x128xf32>
    %cst_83 = arith.constant 1.000000e+00 : f32
    %280 = vector.broadcast %cst_83 : f32 to vector<2x128xf32>
    %281 = arith.addf %280, %279 : vector<2x128xf32>
    %282 = arith.divf %280, %281 : vector<2x128xf32>
    %283 = math.tanh %277 : vector<2x128xf32>
    %284 = vector.extract_strided_slice %282 {offsets = [0, 0], sizes = [2, 32], strides = [1, 1]} : vector<2x128xf32> to vector<2x32xf32>
    %285 = vector.extract_strided_slice %282 {offsets = [0, 32], sizes = [2, 32], strides = [1, 1]} : vector<2x128xf32> to vector<2x32xf32>
    %286 = vector.extract_strided_slice %283 {offsets = [0, 64], sizes = [2, 32], strides = [1, 1]} : vector<2x128xf32> to vector<2x32xf32>
    %287 = vector.extract_strided_slice %282 {offsets = [0, 96], sizes = [2, 32], strides = [1, 1]} : vector<2x128xf32> to vector<2x32xf32>
    %288 = arith.mulf %285, %252 : vector<2x32xf32>
    %289 = arith.mulf %284, %286 : vector<2x32xf32>
    %290 = arith.addf %288, %289 : vector<2x32xf32>
    %291 = math.tanh %290 : vector<2x32xf32>
    %292 = arith.mulf %287, %291 : vector<2x32xf32>
    %c12_84 = arith.constant 12 : index
    %c0_85 = arith.constant 0 : index
    %293 = vector.load %arg15[%c12_84, %c0_85] : memref<16x32xf32, #tpu.memory_space<vmem>>, vector<2x32xf32>
    tpu.vector_store %arg15[%c12_84, %c0_85], %292 {strides = array<i32>} : memref<16x32xf32, #tpu.memory_space<vmem>>, vector<2x32xf32>,
    %c14 = arith.constant 14 : index
    %c0_86 = arith.constant 0 : index
    %294 = vector.load %arg16[%c14, %c0_86] : memref<16x128xf32, #tpu.memory_space<vmem>>, vector<2x128xf32>
    %cst_87 = arith.constant dense<0.000000e+00> : vector<2x128xf32>
    %295 = tpu.matmul %273, %14, %cst_87 {dimension_numbers = #tpu.dot_dimension_numbers<[1], [0], [0], [1], [0, 0, 1, 1], [], []>} : vector<2x32xf32>, vector<32x128xf32>, vector<2x128xf32> -> vector<2x128xf32>
    %296 = arith.addf %294, %295 : vector<2x128xf32>
    %297 = arith.negf %296 : vector<2x128xf32>
    %298 = math.exp %297 : vector<2x128xf32>
    %cst_88 = arith.constant 1.000000e+00 : f32
    %299 = vector.broadcast %cst_88 : f32 to vector<2x128xf32>
    %300 = arith.addf %299, %298 : vector<2x128xf32>
    %301 = arith.divf %299, %300 : vector<2x128xf32>
    %302 = math.tanh %296 : vector<2x128xf32>
    %303 = vector.extract_strided_slice %301 {offsets = [0, 0], sizes = [2, 32], strides = [1, 1]} : vector<2x128xf32> to vector<2x32xf32>
    %304 = vector.extract_strided_slice %301 {offsets = [0, 32], sizes = [2, 32], strides = [1, 1]} : vector<2x128xf32> to vector<2x32xf32>
    %305 = vector.extract_strided_slice %302 {offsets = [0, 64], sizes = [2, 32], strides = [1, 1]} : vector<2x128xf32> to vector<2x32xf32>
    %306 = vector.extract_strided_slice %301 {offsets = [0, 96], sizes = [2, 32], strides = [1, 1]} : vector<2x128xf32> to vector<2x32xf32>
    %307 = arith.mulf %304, %271 : vector<2x32xf32>
    %308 = arith.mulf %303, %305 : vector<2x32xf32>
    %309 = arith.addf %307, %308 : vector<2x32xf32>
    %310 = math.tanh %309 : vector<2x32xf32>
    %311 = arith.mulf %306, %310 : vector<2x32xf32>
    %cst_89 = arith.constant dense<0.000000e+00> : vector<2x128xf32>
    %312 = tpu.matmul %311, %15, %cst_89 {dimension_numbers = #tpu.dot_dimension_numbers<[1], [0], [0], [1], [0, 0, 1, 1], [], []>} : vector<2x32xf32>, vector<32x128xf32>, vector<2x128xf32> -> vector<2x128xf32>
    %cst_90 = arith.constant dense<0.000000e+00> : vector<2x128xf32>
    %313 = tpu.matmul %292, %16, %cst_90 {dimension_numbers = #tpu.dot_dimension_numbers<[1], [0], [0], [1], [0, 0, 1, 1], [], []>} : vector<2x32xf32>, vector<32x128xf32>, vector<2x128xf32> -> vector<2x128xf32>
    %314 = arith.addf %312, %313 : vector<2x128xf32>
    %315 = arith.addf %314, %19 : vector<2x128xf32>
    %316 = arith.negf %315 : vector<2x128xf32>
    %317 = math.exp %316 : vector<2x128xf32>
    %cst_91 = arith.constant 1.000000e+00 : f32
    %318 = vector.broadcast %cst_91 : f32 to vector<2x128xf32>
    %319 = arith.addf %318, %317 : vector<2x128xf32>
    %320 = arith.divf %318, %319 : vector<2x128xf32>
    %321 = math.tanh %315 : vector<2x128xf32>
    %322 = vector.extract_strided_slice %320 {offsets = [0, 0], sizes = [2, 32], strides = [1, 1]} : vector<2x128xf32> to vector<2x32xf32>
    %323 = vector.extract_strided_slice %320 {offsets = [0, 32], sizes = [2, 32], strides = [1, 1]} : vector<2x128xf32> to vector<2x32xf32>
    %324 = vector.extract_strided_slice %321 {offsets = [0, 64], sizes = [2, 32], strides = [1, 1]} : vector<2x128xf32> to vector<2x32xf32>
    %325 = vector.extract_strided_slice %320 {offsets = [0, 96], sizes = [2, 32], strides = [1, 1]} : vector<2x128xf32> to vector<2x32xf32>
    %326 = arith.mulf %323, %290 : vector<2x32xf32>
    %327 = arith.mulf %322, %324 : vector<2x32xf32>
    %328 = arith.addf %326, %327 : vector<2x32xf32>
    %329 = math.tanh %328 : vector<2x32xf32>
    %330 = arith.mulf %325, %329 : vector<2x32xf32>
    %c14_92 = arith.constant 14 : index
    %c0_93 = arith.constant 0 : index
    %331 = vector.load %arg15[%c14_92, %c0_93] : memref<16x32xf32, #tpu.memory_space<vmem>>, vector<2x32xf32>
    tpu.vector_store %arg15[%c14_92, %c0_93], %330 {strides = array<i32>} : memref<16x32xf32, #tpu.memory_space<vmem>>, vector<2x32xf32>,
    %c0_94 = arith.constant 0 : index
    %c0_95 = arith.constant 0 : index
    %332 = vector.load %arg15[%c0_94, %c0_95] : memref<16x32xf32, #tpu.memory_space<vmem>>, vector<16x32xf32>
    %c0_96 = arith.constant 0 : index
    %c0_97 = arith.constant 0 : index
    %333 = vector.load %arg8[%c0_96, %c0_97] : memref<32x128xf32, #tpu.memory_space<vmem>>, vector<32x128xf32>
    %cst_98 = arith.constant dense<0.000000e+00> : vector<16x128xf32>
    %334 = tpu.matmul %332, %333, %cst_98 {dimension_numbers = #tpu.dot_dimension_numbers<[1], [0], [0], [1], [0, 0, 1, 1], [], []>} : vector<16x32xf32>, vector<32x128xf32>, vector<16x128xf32> -> vector<16x128xf32>
    %c0_99 = arith.constant 0 : index
    %c0_100 = arith.constant 0 : index
    %335 = vector.load %arg9[%c0_99, %c0_100] : memref<1x128xf32, #tpu.memory_space<vmem>>, vector<1x128xf32>
    %336 = vector.broadcast %335 : vector<1x128xf32> to vector<16x128xf32>
    %337 = arith.addf %334, %336 : vector<16x128xf32>
    %c0_101 = arith.constant 0 : index
    %c0_102 = arith.constant 0 : index
    %338 = vector.load %arg12[%c0_101, %c0_102] : memref<16x128xf32, #tpu.memory_space<vmem>>, vector<16x128xf32>
    tpu.vector_store %arg12[%c0_101, %c0_102], %337 {strides = array<i32>} : memref<16x128xf32, #tpu.memory_space<vmem>>, vector<16x128xf32>,
    %c0_103 = arith.constant 0 : index
    %c0_104 = arith.constant 0 : index
    %c0_105 = arith.constant 0 : index
    %339 = vector.load %arg13[%c0_103, %c0_104, %c0_105] : memref<2x2x32xf32, #tpu.memory_space<vmem>>, vector<1x2x32xf32>
    %340 = vector.shape_cast %339 : vector<1x2x32xf32> to vector<2x32xf32>
    %341 = vector.shape_cast %311 : vector<2x32xf32> to vector<1x2x32xf32>
    tpu.vector_store %arg13[%c0_103, %c0_104, %c0_105], %341 {strides = array<i32>} : memref<2x2x32xf32, #tpu.memory_space<vmem>>, vector<1x2x32xf32>,
    %c1_106 = arith.constant 1 : index
    %c0_107 = arith.constant 0 : index
    %c0_108 = arith.constant 0 : index
    %342 = vector.load %arg13[%c1_106, %c0_107, %c0_108] : memref<2x2x32xf32, #tpu.memory_space<vmem>>, vector<1x2x32xf32>
    %343 = vector.shape_cast %342 : vector<1x2x32xf32> to vector<2x32xf32>
    %344 = vector.shape_cast %330 : vector<2x32xf32> to vector<1x2x32xf32>
    tpu.vector_store %arg13[%c1_106, %c0_107, %c0_108], %344 {strides = array<i32>} : memref<2x2x32xf32, #tpu.memory_space<vmem>>, vector<1x2x32xf32>,
    %c0_109 = arith.constant 0 : index
    %c0_110 = arith.constant 0 : index
    %c0_111 = arith.constant 0 : index
    %345 = vector.load %arg14[%c0_109, %c0_110, %c0_111] : memref<2x2x32xf32, #tpu.memory_space<vmem>>, vector<1x2x32xf32>
    %346 = vector.shape_cast %345 : vector<1x2x32xf32> to vector<2x32xf32>
    %347 = vector.shape_cast %309 : vector<2x32xf32> to vector<1x2x32xf32>
    tpu.vector_store %arg14[%c0_109, %c0_110, %c0_111], %347 {strides = array<i32>} : memref<2x2x32xf32, #tpu.memory_space<vmem>>, vector<1x2x32xf32>,
    %c1_112 = arith.constant 1 : index
    %c0_113 = arith.constant 0 : index
    %c0_114 = arith.constant 0 : index
    %348 = vector.load %arg14[%c1_112, %c0_113, %c0_114] : memref<2x2x32xf32, #tpu.memory_space<vmem>>, vector<1x2x32xf32>
    %349 = vector.shape_cast %348 : vector<1x2x32xf32> to vector<2x32xf32>
    %350 = vector.shape_cast %328 : vector<2x32xf32> to vector<1x2x32xf32>
    tpu.vector_store %arg14[%c1_112, %c0_113, %c0_114], %350 {strides = array<i32>} : memref<2x2x32xf32, #tpu.memory_space<vmem>>, vector<1x2x32xf32>,
    return
  }
}

</mosaic_0001>

<bundles_post_ra>
// kernel: tpu_custom_call.1
= control target key start
LH: loop header
LB: loop body
LE: loop exit
PB: predicated region body
PF: predicated region fallthrough
CT: control target
= control target key end

     0   :  { %20 = vsyncpa [#allocation5], 0  ;;  %vm82_vm0 = vcmask 261120   ;;  %v3718_v6 = vmov 0   ;;  %s4320_s0 = inlined_call_operand.vmem [shape: s32[16,1], index: 0, kind: input, shape index: {}]   ;;  %s4321_s1 = inlined_call_operand.vmem [shape: f32[128,32], index: 1, kind: input, shape index: {}]   ;;  %s4322_s2 = inlined_call_operand.vmem [shape: f32[32,128], index: 2, kind: input, shape index: {}]   ;;  %s4323_s3 = inlined_call_operand.vmem [shape: f32[32,128], index: 3, kind: input, shape index: {}]   ;;  %s4324_s4 = inlined_call_operand.vmem [shape: f32[1,128], index: 4, kind: input, shape index: {}]   ;;  %s4325_s5 = inlined_call_operand.vmem [shape: f32[32,128], index: 5, kind: input, shape index: {}]   ;;  %s4326_s6 = inlined_call_operand.vmem [shape: f32[32,128], index: 6, kind: input, shape index: {}]   ;;  %s4327_s7 = inlined_call_operand.vmem [shape: f32[1,128], index: 7, kind: input, shape index: {}]   ;;  %s4328_s8 = inlined_call_operand.vmem [shape: f32[32,128], index: 8, kind: input, shape index: {}]   ;;  %s4329_s9 = inlined_call_operand.vmem [shape: f32[1,128], index: 9, kind: input, shape index: {}]   ;;  %s4330_s10 = inlined_call_operand.vmem [shape: f32[2,2,32], index: 10, kind: input, shape index: {}]   ;;  %s4331_s11 = inlined_call_operand.vmem [shape: f32[2,2,32], index: 11, kind: input, shape index: {}]   ;;  %s4332_s12 = inlined_call_operand.hbm [shape: f32[16,128], index: 12, kind: output, shape index: {0}]   ;;  %s4333_s13 = inlined_call_operand.hbm [shape: f32[2,2,32], index: 13, kind: output, shape index: {1}]   ;;  %s4334_s14 = inlined_call_operand.hbm [shape: f32[2,2,32], index: 14, kind: output, shape index: {2}]  }
   0x1   :  { %v78_v0 = vld [vmem:[%s4322_s2] sm:$0xff]  ;;  %v79_v1 = vld [vmem:[%s4322_s2 + $0x8] sm:$0xff]  ;;  %v80_v2 = vld [vmem:[%s4322_s2 + $0x10] sm:$0xff]  ;;  %3519 = vset.pattern.permute.xlu0 %v3718_v6 }
   0x2   :  { %v3313_v3 = vpack.c.bf16 %v79_v1, %v78_v0  ;;  %v81_v4 = vld [vmem:[%s4322_s2 + $0x18] sm:$0xff]  ;;  %v62_v5 = vld [vmem:[%s4321_s1] sm:$0xff] }
   0x3   :  { %v3317_v7 = vpack.c.bf16 %v81_v4, %v80_v2  ;;  %2979 = vmatprep.mubr.msk.f32.mxu0 %vm82_vm0, %v62_v5  ;;  %v46_v8 = vld [vmem:[%s4320_s0] sm:$0xff] }
   0x4   :  { %3314 = vmatprep.subr.bf16.mxu0 %v3313_v3  ;;  %51 = vperm.xlu0 %3519, %v46_v8  }
   0x5   :  { %3316 = vmatpush3.bf16.msra.mxu0 %v3313_v3 }
   0x6   :  { %3318 = vmatprep.subr.bf16.mxu0 %v3317_v7 }
   0x7   :  { %21 = vsyncpa [#allocation7], 0  ;;  %v63_v9 = vld [vmem:[%s4321_s1 + $0x8] sm:$0xff]  ;;  %v64_v11 = vld [vmem:[%s4321_s1 + $0x10] sm:$0xff]  ;;  %v3719_v27 = vmov 0.0|0.0   ;;  %v48_v32 = vlaneseq  ;;  %vm3720_vm1 = vmmov 0  }
   0x8   :  { %v47_v10 = vld [vmem:[%s4320_s0 + $0x8] sm:$0xff]  ;;  %v65_v12 = vld [vmem:[%s4321_s1 + $0x18] sm:$0xff]  ;;  %v66_v13 = vld [vmem:[%s4321_s1 + $0x20] sm:$0xff]  ;;  %v3721_v35 = vmov 0.0   ;;  %v3722_v37 = vmov 1.0   ;;  %s3723_s30 = smov 64  }
   0x9   :  { %3320 = vmatpush3.bf16.msra.mxu0 %v3317_v7  ;;  %54 = vperm.xlu0 %3519, %v47_v10   ;;  %v67_v14 = vld [vmem:[%s4321_s1 + $0x28] sm:$0xff]  ;;  %v68_v15 = vld [vmem:[%s4321_s1 + $0x30] sm:$0xff]  ;;  %v69_v16 = vld [vmem:[%s4321_s1 + $0x38] sm:$0xff]  ;;  %v49_v34 = vand.u32 127, %v48_v32  ;;  %s3724_s17 = smov 32   ;;  %vm669_vm4 = vcmask 254976  }
   0xa   :  { %v70_v17 = vld [vmem:[%s4321_s1 + $0x40] sm:$0xff]  ;;  %v71_v18 = vld [vmem:[%s4321_s1 + $0x48] sm:$0xff]  ;;  %v72_v19 = vld [vmem:[%s4321_s1 + $0x50] sm:$0xff]  ;;  %3353 = vmatprep.subr.bf16.mxu0 %v3719_v27 }
   0xb   :  { %v73_v20 = vld [vmem:[%s4321_s1 + $0x58] sm:$0xff]  ;;  %v74_v21 = vld [vmem:[%s4321_s1 + $0x60] sm:$0xff]  ;;  %v75_v22 = vld [vmem:[%s4321_s1 + $0x68] sm:$0xff] }
   0xc   :  { %2980 = vmatmul.mubr.msk.f32.vlgmr.msra.gmra.mrb[0].mxu0 %vm82_vm0, %v63_v9  ;;  %v76_v23 = vld [vmem:[%s4321_s1 + $0x70] sm:$0xff]  ;;  %v77_v24 = vld [vmem:[%s4321_s1 + $0x78] sm:$0xff]  ;;  %v360_v25 = vld [vmem:[%s4323_s3] sm:$0xff] }
   0xd   :  { %2982 = vmatprep.mubr.msk.f32.mxu0 %vm82_vm0, %v64_v11  ;;  %v361_v26 = vld [vmem:[%s4323_s3 + $0x8] sm:$0xff]  ;;  %v362_v29 = vld [vmem:[%s4323_s3 + $0x10] sm:$0xff]  ;;  %v363_v30 = vld [vmem:[%s4323_s3 + $0x18] sm:$0xff] }
   0xe   :  { %v3896_v28 = vpack.c.bf16 %v361_v26, %v360_v25  ;;  %v3906_v31 = vpack.c.bf16 %v363_v30, %v362_v29  ;;  %v379_v33 = vld [vmem:[%s4330_s10] sm:$0x3]  ;;  %v365_v26 = vld [vmem:[%s4325_s5 + $0x8] sm:$0xff]  ;;  %v366_v29 = vld [vmem:[%s4325_s5 + $0x10] sm:$0xff] }
   0xf   :  { %v2758_v1 = vld [vmem:[%s4324_s4] ss:$0 sm:$0xff]  ;;  %v367_v30 = vld [vmem:[%s4325_s5 + $0x18] sm:$0xff] }
  0x10   :  { %2983 = vmatmul.mubr.msk.f32.gmra.mrb[2].mxu0 %vm82_vm0, %v65_v12  ;;  %v380_v9 = vld [vmem:[%s4331_s11] sm:$0x3] }
  0x11   :  { %2985 = vmatprep.mubr.msk.f32.mxu0 %vm82_vm0, %v66_v13  ;;  %3355 = vmatpush3.bf16.msra.mxu0 %v3896_v28  ;;  %v364_v25 = vld [vmem:[%s4325_s5] sm:$0xff] }
  0x12   :  { %3356 = vmatprep.subr.bf16.mxu0 %v3719_v27 }
  0x14   :  { %2986 = vmatmul.mubr.msk.f32.gmra.mrb[4].mxu0 %vm82_vm0, %v67_v14 }
  0x15   :  { %2988 = vmatprep.mubr.msk.f32.mxu0 %vm82_vm0, %v68_v15  ;;  %3358 = vmatpush3.bf16.msra.mxu0 %v3906_v31 }
  0x16   :  { %3365 = vmatprep.subr.bf16.mxu0 %v3719_v27 }
  0x18   :  { %2989 = vmatmul.mubr.msk.f32.gmra.mrb[6].mxu0 %vm82_vm0, %v69_v16 }
  0x19   :  { %2991 = vmatprep.mubr.msk.f32.mxu0 %vm82_vm0, %v70_v17 }
  0x1c   :  { %2992 = vmatmul.mubr.msk.f32.gmra.mrb[8].mxu0 %vm82_vm0, %v71_v18 }
  0x1d   :  { %2994 = vmatprep.mubr.msk.f32.mxu0 %vm82_vm0, %v72_v19 }
  0x20   :  { %2995 = vmatmul.mubr.msk.f32.gmra.mrb[10].mxu0 %vm82_vm0, %v73_v20  ;;  %v368_v20 = vld [vmem:[%s4326_s6] sm:$0xff] }
  0x21   :  { %2997 = vmatprep.mubr.msk.f32.mxu0 %vm82_vm0, %v74_v21  ;;  %v369_v21 = vld [vmem:[%s4326_s6 + $0x8] sm:$0xff] }
  0x24   :  { %2998 = vmatmul.mubr.msk.f32.gmra.mrb[12].mxu0 %vm82_vm0, %v75_v22  ;;  %v370_v22 = vld [vmem:[%s4326_s6 + $0x10] sm:$0xff] }
  0x25   :  { %3000 = vmatprep.mubr.msk.f32.mxu0 %vm82_vm0, %v76_v23  ;;  %v3942_v23 = vpack.c.bf16 %v369_v21, %v368_v20 }
  0x28   :  { %3001 = vmatmul.mubr.msk.f32.gmra.mrb[14].mxu0 %vm82_vm0, %v77_v24  ;;  %v371_v24 = vld [vmem:[%s4326_s6 + $0x18] sm:$0xff] }
  0x29   :  { %3046 = vmatprep.mubr.msk.f32.mxu0 %vm3720_vm1, %v3721_v35  ;;  %v3960_v32 = vpack.c.bf16 %v371_v24, %v370_v22 }
  0x2c   :  { %3047 = vmatmul.mubr.msk.f32.vlgmr.msra.gmra.mrb[16].mxu0 %vm82_vm0, %v379_v33  ;;  %v3962_v33 = vpack.c.bf16 %v365_v26, %v364_v25 }
  0x2d   :  { %3068 = vmatprep.mubr.msk.f32.mxu0 %vm3720_vm1, %v3721_v35 }
  0x2e   :  { %3367 = vmatpush3.bf16.msra.mxu0 %v3962_v33 }
  0x2f   :  { %3368 = vmatprep.subr.bf16.mxu0 %v3719_v27 }
  0x83   :  { %v52_v36 = vpop.permute.xlu0 %51 }
  0x84   :  { %vm56_vm2 = vcmp.eq.s32.totalorder %v49_v34, %v52_v36  ;;  %v2762_v36 = vld [vmem:[%s4330_s10 + $0x2] sm:$0x3] }
  0x85   :  { %3035 = vmatprep.mubr.msk.f32.mxu1 %vm56_vm2, %v3722_v37 }
  0x88   :  { %v55_v62 = vpop.permute.xlu0 %54 }
  0x89   :  { %vm57_vm3 = vcmp.eq.s32.totalorder %v49_v34, %v55_v62  ;;  %v3966_v34 = vpack.c.bf16 %v367_v30, %v366_v29 }
  0x8b   :  { %3370 = vmatpush3.bf16.msra.mxu0 %v3966_v34 }
  0x8c   :  { %3377 = vmatprep.subr.bf16.mxu0 %v3719_v27 }
  0xdf   :  { %v2981_v38 = vpop.f32.mrb[0].mxu0 }
  0xe0   :  { %v197_v39 = vpop.f32.mrb[1].mxu0 }
  0xe1   :  { %v3321_v40 = vpack.c.bf16 %v2981_v38, %v197_v39 }
  0xe3   :  { %v2984_v41 = vpop.f32.mrb[2].mxu0  ;;  %3322 = vmatprep.subr.bf16.mxu1 %v3321_v40 }
  0xe4   :  { %v207_v42 = vpop.f32.mrb[3].mxu0  ;;  %3324 = vmatpush3.bf16.msra.mxu1 %v3321_v40 }
  0xe5   :  { %v3325_v43 = vpack.c.bf16 %v2984_v41, %v207_v42 }
  0xe7   :  { %v2987_v44 = vpop.f32.mrb[4].mxu0  ;;  %3326 = vmatprep.subr.bf16.mxu1 %v3325_v43 }
  0xe8   :  { %v217_v45 = vpop.f32.mrb[5].mxu0  ;;  %3328 = vmatpush3.bf16.msra.mxu1 %v3325_v43  ;;  %v4002_v43 = vld [vmem:[%s4327_s7] ss:$0 sm:$0xff] }
  0xe9   :  { %v3329_v46 = vpack.c.bf16 %v2987_v44, %v217_v45 }
  0xeb   :  { %v2990_v47 = vpop.f32.mrb[6].mxu0  ;;  %3330 = vmatprep.subr.bf16.mxu1 %v3329_v46 }
  0xec   :  { %v227_v48 = vpop.f32.mrb[7].mxu0  ;;  %3332 = vmatpush3.bf16.msra.mxu1 %v3329_v46 }
  0xed   :  { %v3333_v49 = vpack.c.bf16 %v2990_v47, %v227_v48 }
  0xef   :  { %v2993_v50 = vpop.f32.mrb[8].mxu0  ;;  %3334 = vmatprep.subr.bf16.mxu1 %v3333_v49 }
  0xf0   :  { %v237_v51 = vpop.f32.mrb[9].mxu0  ;;  %3336 = vmatpush3.bf16.msra.mxu1 %v3333_v49 }
  0xf1   :  { %v3337_v52 = vpack.c.bf16 %v2993_v50, %v237_v51 }
  0xf3   :  { %v2996_v53 = vpop.f32.mrb[10].mxu0  ;;  %3338 = vmatprep.subr.bf16.mxu1 %v3337_v52 }
  0xf4   :  { %v247_v54 = vpop.f32.mrb[11].mxu0  ;;  %3340 = vmatpush3.bf16.msra.mxu1 %v3337_v52 }
  0xf5   :  { %v3341_v55 = vpack.c.bf16 %v2996_v53, %v247_v54  ;;  %v2763_v54 = vld [vmem:[%s4331_s11 + $0x2] sm:$0x3]  ;;  %s3725_s11 = smov 96  }
  0xf7   :  { %v2999_v56 = vpop.f32.mrb[12].mxu0  ;;  %3342 = vmatprep.subr.bf16.mxu1 %v3341_v55 }
  0xf8   :  { %v257_v57 = vpop.f32.mrb[13].mxu0  ;;  %3344 = vmatpush3.bf16.msra.mxu1 %v3341_v55 }
  0xf9   :  { %v3345_v58 = vpack.c.bf16 %v2999_v56, %v257_v57 }
  0xfb   :  { %v3002_v59 = vpop.f32.mrb[14].mxu0  ;;  %3346 = vmatprep.subr.bf16.mxu1 %v3345_v58 }
  0xfc   :  { %v267_v60 = vpop.f32.mrb[15].mxu0  ;;  %3348 = vmatpush3.bf16.msra.mxu1 %v3345_v58 }
  0xfd   :  { %v3349_v61 = vpack.c.bf16 %v3002_v59, %v267_v60 }
  0xff   :  { %3350 = vmatprep.subr.bf16.mxu1 %v3349_v61  ;;  %v455_v63 = vpop.f32.mrb[16].mxu0 }
 0x100   :  { %3352 = vmatpush3.bf16.msra.mxu1 %v3349_v61  ;;  %v3048_v0 = vpop.f32.mrb[17].mxu0 }
 0x101   :  { %3359 = vmatprep.subr.bf16.mxu1 %v3719_v27 }
 0x103   :  { %3036 = vmatmul.mubr.msk.f32.vlgmr.msra.gmra.mrb[0].mxu1 %vm57_vm3, %v3722_v37 }
 0x104   :  { %3057 = vmatprep.mubr.msk.f32.mxu1 %vm3720_vm1, %v3721_v35  ;;  %3361 = vmatpush3.bf16.msra.mxu1 %v3942_v23 }
 0x105   :  { %3362 = vmatprep.subr.bf16.mxu1 %v3719_v27 }
 0x108   :  { %3364 = vmatpush3.bf16.msra.mxu1 %v3960_v32 }
 0x109   :  { %3371 = vmatprep.subr.bf16.mxu1 %v3719_v27 }
 0x10b   :  { %3058 = vmatmul.mubr.msk.f32.vlgmr.msra.gmra.mrb[2].mxu1 %vm82_vm0, %v2762_v36 }
 0x10c   :  { %3373 = vmatpush3.bf16.msra.mxu1 %v3896_v28  ;;  %3079 = vmatprep.mubr.msk.f32.mxu1 %vm3720_vm1, %v3721_v35 }
 0x10d   :  { %3374 = vmatprep.subr.bf16.mxu1 %v3719_v27 }
 0x110   :  { %3376 = vmatpush3.bf16.msra.mxu1 %v3906_v31 }
 0x111   :  { %3383 = vmatprep.subr.bf16.mxu1 %v3719_v27 }
 0x1d6   :  { %v3037_v2 = vpop.f32.mrb[0].mxu1 }
 0x1d7   :  { %v355_v3 = vadd.f32 %v3037_v2, %v2758_v1  ;;  %v349_v4 = vpop.f32.mrb[1].mxu1 }
 0x1d8   :  { %v350_v5 = vadd.f32 %v2758_v1, %v349_v4 }
 0x1d9   :  { %359 = vst [vmem:[#allocation3 + $0x8] sm:$0xff] %v355_v3 }
 0x1da   :  { %358 = vst [vmem:[#allocation3] sm:$0xff] %v350_v5 }
 0x1de   :  { %v557_v40 = vpop.f32.mrb[2].mxu1 }
 0x1df   :  { %v3059_v41 = vpop.f32.mrb[3].mxu1 }
 0x1e1   :  { %v385_v6 = vld [vmem:[#allocation3] sm:$0x3]  ;;  %v671_v45 = vld [vmem:[#allocation3 + $0x2] sm:$0x3]  ;;  %v944_v25 = vld [vmem:[#allocation3 + $0x4] sm:$0x3] }
 0x1e2   :  { %v459_v7 = vadd.f32 %v455_v63, %v385_v6 }
 0x1e4   :  { %3520 = vtanh.f32 %v459_v7  ;;  %v2765_v10 = vmul.f32 -1.442695, %v459_v7 }
 0x1e6   :  { %3522 = vpow2.f32 %v2765_v10 }
 0x1ee   :  { %v3521_v8 = vpop.eup %3520 }
 0x1ef   :  { %473 = vrot.lane.b32.xlu1 %v3521_v8, %s3723_s30 }
 0x1f0   :  { %v3523_v11 = vpop.eup %3522 }
 0x1f1   :  { %v463_v12 = vadd.f32 1.0, %v3523_v11 }
 0x1f3   :  { %468 = vrot.lane.b32.xlu1 %v380_v9, %s3724_s17  ;;  %3524 = vrcp.f32 %v463_v12 }
 0x1fd   :  { %v3525_v13 = vpop.eup %3524 }
 0x261   :  { %v474_v14 = vpop.permute.xlu1 %473 }
 0x262   :  { %v476_v15 = vmul.f32 %v3525_v13, %v474_v14 }
 0x264   :  { %478 = vrot.lane.b32.xlu0 %v476_v15, %s3724_s17 }
 0x265   :  { %v469_v16 = vpop.permute.xlu1 %468 }
 0x266   :  { %v471_v17 = vmul.f32 %v3525_v13, %v469_v16 }
 0x2d6   :  { %v479_v18 = vpop.permute.xlu0 %478 }
 0x2d7   :  { %v3930_v19 = vadd.f32 %v479_v18, %v471_v17 }
 0x2d9   :  { %3526 = vtanh.f32 %v3930_v19 }
 0x2e3   :  { %v3527_v37 = vpop.eup %3526 }
 0x2e4   :  { %484 = vrot.lane.b32.xlu1 %v3527_v37, %s3723_s30 }
 0x356   :  { %v485_v38 = vpop.permute.xlu1 %484 }
 0x357   :  { %v487_v39 = vmul.f32 %v3525_v13, %v485_v38 }
 0x359   :  { %562 = vrot.lane.b32.xlu0 %v487_v39, %s3724_s17 }
 0x3cb   :  { %v563_v42 = vpop.permute.xlu0 %562 }
 0x3cc   :  { %3069 = vmatmul.mubr.msk.f32.vlgmr.msra.gmra.mrb[18].mxu0 %vm82_vm0, %v563_v42  ;;  %3080 = vmatmul.mubr.msk.f32.vlgmr.msra.gmra.mrb[4].mxu1 %vm82_vm0, %v563_v42 }
 0x3cd   :  { %3385 = vmatpush3.bf16.msra.mxu1 %v3962_v33  ;;  %3379 = vmatpush3.bf16.msra.mxu0 %v3942_v23 }
 0x3ce   :  { %3386 = vmatprep.subr.bf16.mxu1 %v3719_v27  ;;  %3380 = vmatprep.subr.bf16.mxu0 %v3719_v27 }
 0x3cf   :  { %3101 = vmatprep.mubr.msk.f32.mxu1 %vm3720_vm1, %v3721_v35  ;;  %3090 = vmatprep.mubr.msk.f32.mxu0 %vm3720_vm1, %v3721_v35 }
 0x3d1   :  { %3388 = vmatpush3.bf16.msra.mxu1 %v3966_v34  ;;  %3382 = vmatpush3.bf16.msra.mxu0 %v3960_v32 }
 0x3d2   :  { %3389 = vmatprep.subr.bf16.mxu0 %v3719_v27  ;;  %3395 = vmatprep.subr.bf16.mxu1 %v3719_v27 }
 0x49f   :  { %v632_v44 = vpop.f32.mrb[18].mxu0  ;;  %v738_v46 = vpop.f32.mrb[4].mxu1 }
 0x4a0   :  { %v633_v47 = vadd.f32 %v632_v44, %v557_v40  ;;  %v742_v48 = vadd.f32 %v738_v46, %v671_v45  ;;  %v3070_v49 = vpop.f32.mrb[19].mxu0  ;;  %v3081_v50 = vpop.f32.mrb[5].mxu1 }
 0x4a2   :  { %v636_v51 = vadd.f32 %v4002_v43, %v633_v47  ;;  %3528 = vtanh.f32 %v742_v48  ;;  %v2770_v55 = vmul.f32 -1.442695, %v742_v48 }
 0x4a4   :  { %3530 = vtanh.f32 %v636_v51  ;;  %v2768_v56 = vmul.f32 -1.442695, %v636_v51 }
 0x4a5   :  { %3532 = vpow2.f32 %v2770_v55 }
 0x4a6   :  { %3534 = vpow2.f32 %v2768_v56 }
 0x4ac   :  { %v3529_v52 = vpop.eup %3528 }
 0x4ad   :  { %752 = vrot.lane.b32.xlu0 %v3529_v52, %s3723_s30 }
 0x4ae   :  { %v3531_v53 = vpop.eup %3530 }
 0x4af   :  { %650 = vrot.lane.b32.xlu1 %v3531_v53, %s3723_s30  ;;  %v3533_v57 = vpop.eup %3532 }
 0x4b0   :  { %v3535_v58 = vpop.eup %3534  ;;  %v746_v59 = vadd.f32 1.0, %v3533_v57 }
 0x4b1   :  { %v640_v60 = vadd.f32 1.0, %v3535_v58 }
 0x4b2   :  { %3536 = vrcp.f32 %v746_v59 }
 0x4b3   :  { %645 = vrot.lane.b32.xlu1 %v2763_v54, %s3724_s17  ;;  %3538 = vrcp.f32 %v640_v60 }
 0x4bc   :  { %v3537_v61 = vpop.eup %3536 }
 0x4bd   :  { %v3539_v0 = vpop.eup %3538  ;;  %v750_v4 = vmul.f32 %v3537_v61, %v3930_v19 }
 0x51f   :  { %v753_v62 = vpop.permute.xlu0 %752 }
 0x520   :  { %v755_v63 = vmul.f32 %v3537_v61, %v753_v62 }
 0x521   :  { %v651_v1 = vpop.permute.xlu1 %650 }
 0x522   :  { %v653_v2 = vmul.f32 %v3539_v0, %v651_v1  ;;  %757 = vrot.lane.b32.xlu1 %v755_v63, %s3724_s17 }
 0x524   :  { %655 = vrot.lane.b32.xlu0 %v653_v2, %s3724_s17 }
 0x525   :  { %v646_v3 = vpop.permute.xlu1 %645 }
 0x526   :  { %v648_v6 = vmul.f32 %v3539_v0, %v646_v3 }
 0x594   :  { %v758_v5 = vpop.permute.xlu1 %757 }
 0x595   :  { %v4014_v7 = vadd.f32 %v758_v5, %v750_v4 }
 0x596   :  { %v656_v8 = vpop.permute.xlu0 %655 }
 0x597   :  { %3540 = vtanh.f32 %v4014_v7  ;;  %v4017_v9 = vadd.f32 %v656_v8, %v648_v6  ;;  %v1217_v6 = vld [vmem:[#allocation3 + $0x6] sm:$0x3] }
 0x599   :  { %3542 = vtanh.f32 %v4017_v9 }
 0x5a1   :  { %v3541_v10 = vpop.eup %3540 }
 0x5a2   :  { %763 = vrot.lane.b32.xlu1 %v3541_v10, %s3723_s30 }
 0x5a3   :  { %v3543_v11 = vpop.eup %3542 }
 0x5a4   :  { %661 = vrot.lane.b32.xlu0 %v3543_v11, %s3723_s30 }
 0x614   :  { %v764_v12 = vpop.permute.xlu1 %763 }
 0x615   :  { %v766_v13 = vmul.f32 %v3537_v61, %v764_v12 }
 0x616   :  { %v662_v14 = vpop.permute.xlu0 %661 }
 0x617   :  { %v664_v15 = vmul.f32 %v3539_v0, %v662_v14  ;;  %840 = vrot.lane.b32.xlu1 %v766_v13, %s3724_s17 }
 0x619   :  { %666 = vrot.lane.b32.xlu0 %v664_v15, %s3724_s17 }
 0x689   :  { %v841_v16 = vpop.permute.xlu1 %840 }
 0x68a   :  { %3102 = vmatmul.mubr.msk.f32.vlgmr.msra.gmra.mrb[6].mxu1 %vm82_vm0, %v841_v16 }
 0x68b   :  { %v667_v17 = vpop.permute.xlu0 %666  ;;  %3397 = vmatpush3.bf16.msra.mxu1 %v3942_v23  ;;  %3123 = vmatprep.mubr.msk.f32.mxu1 %vm3720_vm1, %v3721_v35 }
 0x68c   :  { %670 = vst.msk [vmem:[#allocation2] sm:$0x3] %vm669_vm4, %v667_v17  ;;  %3091 = vmatmul.mubr.msk.f32.vlgmr.msra.gmra.mrb[20].mxu0 %vm82_vm0, %v667_v17  ;;  %3398 = vmatprep.subr.bf16.mxu1 %v3719_v27 }
 0x68d   :  { %3391 = vmatpush3.bf16.msra.mxu0 %v3896_v28  ;;  %3112 = vmatprep.mubr.msk.f32.mxu0 %vm3720_vm1, %v3721_v35 }
 0x68e   :  { %3392 = vmatprep.subr.bf16.mxu0 %v3719_v27 }
 0x68f   :  { %3400 = vmatpush3.bf16.msra.mxu1 %v3960_v32 }
 0x690   :  { %3407 = vmatprep.subr.bf16.mxu1 %v3719_v27 }
 0x691   :  { %3394 = vmatpush3.bf16.msra.mxu0 %v3906_v31 }
 0x692   :  { %3401 = vmatprep.subr.bf16.mxu0 %v3719_v27 }
 0x694   :  { %3113 = vmatmul.mubr.msk.f32.vlgmr.msra.gmra.mrb[22].mxu0 %vm82_vm0, %v841_v16 }
 0x695   :  { %3403 = vmatpush3.bf16.msra.mxu0 %v3962_v33  ;;  %3134 = vmatprep.mubr.msk.f32.mxu0 %vm3720_vm1, %v3721_v35 }
 0x696   :  { %3404 = vmatprep.subr.bf16.mxu0 %v3719_v27 }
 0x699   :  { %3406 = vmatpush3.bf16.msra.mxu0 %v3966_v34 }
 0x69a   :  { %3413 = vmatprep.subr.bf16.mxu0 %v3719_v27 }
 0x75d   :  { %v910_v18 = vpop.f32.mrb[6].mxu1 }
 0x75e   :  { %v3103_v19 = vpop.f32.mrb[7].mxu1 }
 0x75f   :  { %v835_v20 = vpop.f32.mrb[20].mxu0 }
 0x760   :  { %v911_v21 = vadd.f32 %v910_v18, %v835_v20  ;;  %v3092_v22 = vpop.f32.mrb[21].mxu0 }
 0x762   :  { %v914_v24 = vadd.f32 %v4002_v43, %v911_v21 }
 0x764   :  { %3544 = vtanh.f32 %v914_v24  ;;  %v2773_v38 = vmul.f32 -1.442695, %v914_v24 }
 0x767   :  { %v1011_v26 = vpop.f32.mrb[22].mxu0 }
 0x768   :  { %v1015_v29 = vadd.f32 %v1011_v26, %v944_v25  ;;  %v3114_v30 = vpop.f32.mrb[23].mxu0 }
 0x76a   :  { %3546 = vtanh.f32 %v1015_v29  ;;  %v2775_v39 = vmul.f32 -1.442695, %v1015_v29 }
 0x76b   :  { %3548 = vpow2.f32 %v2773_v38 }
 0x76c   :  { %3550 = vpow2.f32 %v2775_v39 }
 0x76e   :  { %v3545_v36 = vpop.eup %3544 }
 0x76f   :  { %924 = vrot.lane.b32.xlu0 %v3545_v36, %s3723_s30 }
 0x774   :  { %v3547_v37 = vpop.eup %3546 }
 0x775   :  { %1025 = vrot.lane.b32.xlu1 %v3547_v37, %s3723_s30  ;;  %v3549_v40 = vpop.eup %3548 }
 0x776   :  { %v918_v41 = vadd.f32 1.0, %v3549_v40  ;;  %v3551_v42 = vpop.eup %3550 }
 0x777   :  { %v1019_v44 = vadd.f32 1.0, %v3551_v42 }
 0x778   :  { %3552 = vrcp.f32 %v918_v41 }
 0x779   :  { %3554 = vrcp.f32 %v1019_v44 }
 0x782   :  { %v3553_v45 = vpop.eup %3552 }
 0x783   :  { %v3555_v48 = vpop.eup %3554  ;;  %v922_v51 = vmul.f32 %v3553_v45, %v4017_v9 }
 0x784   :  { %v1023_v54 = vmul.f32 %v3555_v48, %v4014_v7 }
 0x7e1   :  { %v925_v46 = vpop.permute.xlu0 %924 }
 0x7e2   :  { %v927_v47 = vmul.f32 %v3553_v45, %v925_v46 }
 0x7e4   :  { %929 = vrot.lane.b32.xlu0 %v927_v47, %s3724_s17 }
 0x7e7   :  { %v1026_v49 = vpop.permute.xlu1 %1025 }
 0x7e8   :  { %v1028_v50 = vmul.f32 %v3555_v48, %v1026_v49 }
 0x7ea   :  { %1030 = vrot.lane.b32.xlu1 %v1028_v50, %s3724_s17 }
 0x856   :  { %v930_v52 = vpop.permute.xlu0 %929 }
 0x857   :  { %v4052_v53 = vadd.f32 %v930_v52, %v922_v51 }
 0x859   :  { %3556 = vtanh.f32 %v4052_v53 }
 0x85c   :  { %v1031_v55 = vpop.permute.xlu1 %1030 }
 0x85d   :  { %v4056_v56 = vadd.f32 %v1031_v55, %v1023_v54  ;;  %v1490_v54 = vld [vmem:[#allocation3 + $0x8] sm:$0x3] }
 0x85f   :  { %3558 = vtanh.f32 %v4056_v56 }
 0x863   :  { %v3557_v57 = vpop.eup %3556 }
 0x864   :  { %935 = vrot.lane.b32.xlu0 %v3557_v57, %s3723_s30 }
 0x869   :  { %v3559_v58 = vpop.eup %3558 }
 0x86a   :  { %1036 = vrot.lane.b32.xlu1 %v3559_v58, %s3723_s30 }
 0x8d6   :  { %v936_v59 = vpop.permute.xlu0 %935 }
 0x8d7   :  { %v938_v60 = vmul.f32 %v3553_v45, %v936_v59 }
 0x8d9   :  { %940 = vrot.lane.b32.xlu0 %v938_v60, %s3724_s17 }
 0x8dc   :  { %v1037_v61 = vpop.permute.xlu1 %1036 }
 0x8dd   :  { %v1039_v62 = vmul.f32 %v3555_v48, %v1037_v61 }
 0x8df   :  { %1113 = vrot.lane.b32.xlu1 %v1039_v62, %s3724_s17 }
 0x94b   :  { %v941_v63 = vpop.permute.xlu0 %940 }
 0x94c   :  { %943 = vst.msk [vmem:[#allocation2 + $0x2] sm:$0x3] %vm669_vm4, %v941_v63  ;;  %3124 = vmatmul.mubr.msk.f32.vlgmr.msra.gmra.mrb[8].mxu1 %vm82_vm0, %v941_v63 }
 0x94d   :  { %3409 = vmatpush3.bf16.msra.mxu1 %v3896_v28  ;;  %3145 = vmatprep.mubr.msk.f32.mxu1 %vm3720_vm1, %v3721_v35 }
 0x94e   :  { %3410 = vmatprep.subr.bf16.mxu1 %v3719_v27 }
 0x951   :  { %3412 = vmatpush3.bf16.msra.mxu1 %v3906_v31  ;;  %v1114_v0 = vpop.permute.xlu1 %1113 }
 0x952   :  { %3135 = vmatmul.mubr.msk.f32.vlgmr.msra.gmra.mrb[24].mxu0 %vm82_vm0, %v1114_v0  ;;  %3419 = vmatprep.subr.bf16.mxu1 %v3719_v27 }
 0x953   :  { %3415 = vmatpush3.bf16.msra.mxu0 %v3942_v23  ;;  %3156 = vmatprep.mubr.msk.f32.mxu0 %vm3720_vm1, %v3721_v35 }
 0x954   :  { %3146 = vmatmul.mubr.msk.f32.vlgmr.msra.gmra.mrb[10].mxu1 %vm82_vm0, %v1114_v0  ;;  %3416 = vmatprep.subr.bf16.mxu0 %v3719_v27 }
 0x955   :  { %3421 = vmatpush3.bf16.msra.mxu1 %v3962_v33  ;;  %3167 = vmatprep.mubr.msk.f32.mxu1 %vm3720_vm1, %v3721_v35 }
 0x956   :  { %3422 = vmatprep.subr.bf16.mxu1 %v3719_v27 }
 0x957   :  { %3418 = vmatpush3.bf16.msra.mxu0 %v3960_v32 }
 0x958   :  { %3425 = vmatprep.subr.bf16.mxu0 %v3719_v27 }
 0x959   :  { %3424 = vmatpush3.bf16.msra.mxu1 %v3966_v34 }
 0x95a   :  { %3431 = vmatprep.subr.bf16.mxu1 %v3719_v27 }
 0xa1f   :  { %v1108_v1 = vpop.f32.mrb[8].mxu1 }
 0xa20   :  { %v3125_v2 = vpop.f32.mrb[9].mxu1 }
 0xa25   :  { %v1183_v3 = vpop.f32.mrb[24].mxu0 }
 0xa26   :  { %v1184_v4 = vadd.f32 %v1183_v3, %v1108_v1  ;;  %v3136_v5 = vpop.f32.mrb[25].mxu0 }
 0xa27   :  { %v1284_v7 = vpop.f32.mrb[10].mxu1 }
 0xa28   :  { %v1187_v8 = vadd.f32 %v4002_v43, %v1184_v4  ;;  %v1288_v9 = vadd.f32 %v1284_v7, %v1217_v6  ;;  %v3147_v10 = vpop.f32.mrb[11].mxu1 }
 0xa2a   :  { %3560 = vtanh.f32 %v1187_v8  ;;  %v2778_v13 = vmul.f32 -1.442695, %v1187_v8  ;;  %v2780_v14 = vmul.f32 -1.442695, %v1288_v9 }
 0xa2b   :  { %3562 = vtanh.f32 %v1288_v9 }
 0xa2c   :  { %3564 = vpow2.f32 %v2778_v13 }
 0xa2d   :  { %3566 = vpow2.f32 %v2780_v14 }
 0xa34   :  { %v3561_v11 = vpop.eup %3560 }
 0xa35   :  { %v3563_v12 = vpop.eup %3562  ;;  %1197 = vrot.lane.b32.xlu0 %v3561_v11, %s3723_s30 }
 0xa36   :  { %1298 = vrot.lane.b32.xlu1 %v3563_v12, %s3723_s30  ;;  %v3565_v15 = vpop.eup %3564 }
 0xa37   :  { %v3567_v16 = vpop.eup %3566  ;;  %v1191_v17 = vadd.f32 1.0, %v3565_v15 }
 0xa38   :  { %v1292_v18 = vadd.f32 1.0, %v3567_v16 }
 0xa39   :  { %3568 = vrcp.f32 %v1191_v17 }
 0xa3a   :  { %3570 = vrcp.f32 %v1292_v18 }
 0xa43   :  { %v3569_v19 = vpop.eup %3568 }
 0xa44   :  { %v3571_v21 = vpop.eup %3570  ;;  %v1195_v26 = vmul.f32 %v3569_v19, %v4052_v53 }
 0xa45   :  { %v1296_v29 = vmul.f32 %v3571_v21, %v4056_v56 }
 0xaa7   :  { %v1198_v20 = vpop.permute.xlu0 %1197 }
 0xaa8   :  { %v1299_v22 = vpop.permute.xlu1 %1298  ;;  %v1200_v24 = vmul.f32 %v3569_v19, %v1198_v20 }
 0xaa9   :  { %v1301_v25 = vmul.f32 %v3571_v21, %v1299_v22 }
 0xaaa   :  { %1202 = vrot.lane.b32.xlu0 %v1200_v24, %s3724_s17 }
 0xaab   :  { %1303 = vrot.lane.b32.xlu1 %v1301_v25, %s3724_s17 }
 0xb1c   :  { %v1203_v30 = vpop.permute.xlu0 %1202 }
 0xb1d   :  { %v1304_v36 = vpop.permute.xlu1 %1303  ;;  %v4092_v37 = vadd.f32 %v1203_v30, %v1195_v26 }
 0xb1e   :  { %v4094_v38 = vadd.f32 %v1304_v36, %v1296_v29  ;;  %v1763_v36 = vld [vmem:[#allocation3 + $0xa] sm:$0x3] }
 0xb1f   :  { %3572 = vtanh.f32 %v4092_v37 }
 0xb20   :  { %3574 = vtanh.f32 %v4094_v38 }
 0xb29   :  { %v3573_v39 = vpop.eup %3572 }
 0xb2a   :  { %v3575_v40 = vpop.eup %3574  ;;  %1208 = vrot.lane.b32.xlu0 %v3573_v39, %s3723_s30 }
 0xb2b   :  { %1309 = vrot.lane.b32.xlu1 %v3575_v40, %s3723_s30 }
 0xb9c   :  { %v1209_v41 = vpop.permute.xlu0 %1208 }
 0xb9d   :  { %v1310_v42 = vpop.permute.xlu1 %1309  ;;  %v1211_v44 = vmul.f32 %v3569_v19, %v1209_v41 }
 0xb9e   :  { %v1312_v45 = vmul.f32 %v3571_v21, %v1310_v42 }
 0xb9f   :  { %1213 = vrot.lane.b32.xlu0 %v1211_v44, %s3724_s17 }
 0xba0   :  { %1386 = vrot.lane.b32.xlu1 %v1312_v45, %s3724_s17 }
 0xc11   :  { %v1214_v46 = vpop.permute.xlu0 %1213 }
 0xc12   :  { %v1387_v47 = vpop.permute.xlu1 %1386  ;;  %1216 = vst.msk [vmem:[#allocation2 + $0x4] sm:$0x3] %vm669_vm4, %v1214_v46  ;;  %3157 = vmatmul.mubr.msk.f32.vlgmr.msra.gmra.mrb[26].mxu0 %vm82_vm0, %v1214_v46 }
 0xc13   :  { %3168 = vmatmul.mubr.msk.f32.vlgmr.msra.gmra.mrb[12].mxu1 %vm82_vm0, %v1387_v47  ;;  %3427 = vmatpush3.bf16.msra.mxu0 %v3896_v28 }
 0xc14   :  { %3428 = vmatprep.subr.bf16.mxu0 %v3719_v27  ;;  %3178 = vmatprep.mubr.msk.f32.mxu0 %vm3720_vm1, %v3721_v35 }
 0xc15   :  { %3433 = vmatpush3.bf16.msra.mxu1 %v3942_v23  ;;  %3189 = vmatprep.mubr.msk.f32.mxu1 %vm3720_vm1, %v3721_v35 }
 0xc16   :  { %3434 = vmatprep.subr.bf16.mxu1 %v3719_v27 }
 0xc17   :  { %3430 = vmatpush3.bf16.msra.mxu0 %v3906_v31 }
 0xc18   :  { %3437 = vmatprep.subr.bf16.mxu0 %v3719_v27 }
 0xc19   :  { %3436 = vmatpush3.bf16.msra.mxu1 %v3960_v32 }
 0xc1a   :  { %3179 = vmatmul.mubr.msk.f32.vlgmr.msra.gmra.mrb[28].mxu0 %vm82_vm0, %v1387_v47  ;;  %3443 = vmatprep.subr.bf16.mxu1 %v3719_v27 }
 0xc1b   :  { %3439 = vmatpush3.bf16.msra.mxu0 %v3962_v33  ;;  %3200 = vmatprep.mubr.msk.f32.mxu0 %vm3720_vm1, %v3721_v35 }
 0xc1c   :  { %3440 = vmatprep.subr.bf16.mxu0 %v3719_v27 }
 0xc1f   :  { %3442 = vmatpush3.bf16.msra.mxu0 %v3966_v34 }
 0xc20   :  { %3449 = vmatprep.subr.bf16.mxu0 %v3719_v27 }
 0xce5   :  { %v1381_v48 = vpop.f32.mrb[26].mxu0 }
 0xce6   :  { %v1456_v49 = vpop.f32.mrb[12].mxu1  ;;  %v3158_v50 = vpop.f32.mrb[27].mxu0 }
 0xce7   :  { %v1457_v51 = vadd.f32 %v1456_v49, %v1381_v48  ;;  %v3169_v52 = vpop.f32.mrb[13].mxu1 }
 0xce9   :  { %v1460_v53 = vadd.f32 %v4002_v43, %v1457_v51 }
 0xceb   :  { %3576 = vtanh.f32 %v1460_v53  ;;  %v2783_v60 = vmul.f32 -1.442695, %v1460_v53 }
 0xced   :  { %v1557_v55 = vpop.f32.mrb[28].mxu0 }
 0xcee   :  { %v1561_v56 = vadd.f32 %v1557_v55, %v1490_v54  ;;  %v3180_v57 = vpop.f32.mrb[29].mxu0 }
 0xcf0   :  { %3578 = vtanh.f32 %v1561_v56  ;;  %v2785_v61 = vmul.f32 -1.442695, %v1561_v56 }
 0xcf1   :  { %3580 = vpow2.f32 %v2783_v60 }
 0xcf2   :  { %3582 = vpow2.f32 %v2785_v61 }
 0xcf5   :  { %v3577_v58 = vpop.eup %3576 }
 0xcf6   :  { %1470 = vrot.lane.b32.xlu0 %v3577_v58, %s3723_s30 }
 0xcfa   :  { %v3579_v59 = vpop.eup %3578 }
 0xcfb   :  { %1571 = vrot.lane.b32.xlu1 %v3579_v59, %s3723_s30  ;;  %v3581_v62 = vpop.eup %3580 }
 0xcfc   :  { %v1464_v63 = vadd.f32 1.0, %v3581_v62  ;;  %v3583_v0 = vpop.eup %3582 }
 0xcfd   :  { %v1565_v1 = vadd.f32 1.0, %v3583_v0 }
 0xcfe   :  { %3584 = vrcp.f32 %v1464_v63 }
 0xcff   :  { %3586 = vrcp.f32 %v1565_v1 }
 0xd08   :  { %v3585_v2 = vpop.eup %3584 }
 0xd09   :  { %v3587_v5 = vpop.eup %3586  ;;  %v1468_v8 = vmul.f32 %v3585_v2, %v4092_v37 }
 0xd0a   :  { %v1569_v11 = vmul.f32 %v3587_v5, %v4094_v38 }
 0xd68   :  { %v1471_v3 = vpop.permute.xlu0 %1470 }
 0xd69   :  { %v1473_v4 = vmul.f32 %v3585_v2, %v1471_v3 }
 0xd6b   :  { %1475 = vrot.lane.b32.xlu0 %v1473_v4, %s3724_s17 }
 0xd6d   :  { %v1572_v6 = vpop.permute.xlu1 %1571 }
 0xd6e   :  { %v1574_v7 = vmul.f32 %v3587_v5, %v1572_v6 }
 0xd70   :  { %1576 = vrot.lane.b32.xlu1 %v1574_v7, %s3724_s17 }
 0xddd   :  { %v1476_v9 = vpop.permute.xlu0 %1475 }
 0xdde   :  { %v4130_v10 = vadd.f32 %v1476_v9, %v1468_v8 }
 0xde0   :  { %3588 = vtanh.f32 %v4130_v10 }
 0xde2   :  { %v1577_v12 = vpop.permute.xlu1 %1576 }
 0xde3   :  { %v4134_v13 = vadd.f32 %v1577_v12, %v1569_v11  ;;  %v2036_v11 = vld [vmem:[#allocation3 + $0xc] sm:$0x3] }
 0xde5   :  { %3590 = vtanh.f32 %v4134_v13 }
 0xdea   :  { %v3589_v14 = vpop.eup %3588 }
 0xdeb   :  { %1481 = vrot.lane.b32.xlu0 %v3589_v14, %s3723_s30 }
 0xdef   :  { %v3591_v15 = vpop.eup %3590 }
 0xdf0   :  { %1582 = vrot.lane.b32.xlu1 %v3591_v15, %s3723_s30 }
 0xe5d   :  { %v1482_v16 = vpop.permute.xlu0 %1481 }
 0xe5e   :  { %v1484_v17 = vmul.f32 %v3585_v2, %v1482_v16 }
 0xe60   :  { %1486 = vrot.lane.b32.xlu0 %v1484_v17, %s3724_s17 }
 0xe62   :  { %v1583_v18 = vpop.permute.xlu1 %1582 }
 0xe63   :  { %v1585_v19 = vmul.f32 %v3587_v5, %v1583_v18 }
 0xe65   :  { %1659 = vrot.lane.b32.xlu1 %v1585_v19, %s3724_s17 }
 0xed2   :  { %v1487_v20 = vpop.permute.xlu0 %1486 }
 0xed3   :  { %1489 = vst.msk [vmem:[#allocation2 + $0x6] sm:$0x3] %vm669_vm4, %v1487_v20  ;;  %3190 = vmatmul.mubr.msk.f32.vlgmr.msra.gmra.mrb[14].mxu1 %vm82_vm0, %v1487_v20 }
 0xed4   :  { %3445 = vmatpush3.bf16.msra.mxu1 %v3896_v28  ;;  %3211 = vmatprep.mubr.msk.f32.mxu1 %vm3720_vm1, %v3721_v35 }
 0xed5   :  { %3446 = vmatprep.subr.bf16.mxu1 %v3719_v27 }
 0xed7   :  { %v1660_v21 = vpop.permute.xlu1 %1659 }
 0xed8   :  { %3448 = vmatpush3.bf16.msra.mxu1 %v3906_v31  ;;  %3201 = vmatmul.mubr.msk.f32.vlgmr.msra.gmra.mrb[30].mxu0 %vm82_vm0, %v1660_v21 }
 0xed9   :  { %3451 = vmatpush3.bf16.msra.mxu0 %v3942_v23  ;;  %3455 = vmatprep.subr.bf16.mxu1 %v3719_v27 }
 0xeda   :  { %3452 = vmatprep.subr.bf16.mxu0 %v3719_v27  ;;  %3222 = vmatprep.mubr.msk.f32.mxu0 %vm3720_vm1, %v3721_v35 }
 0xedb   :  { %3212 = vmatmul.mubr.msk.f32.vlgmr.msra.gmra.mrb[16].mxu1 %vm82_vm0, %v1660_v21 }
 0xedc   :  { %3457 = vmatpush3.bf16.msra.mxu1 %v3962_v33  ;;  %3233 = vmatprep.mubr.msk.f32.mxu1 %vm3720_vm1, %v3721_v35 }
 0xedd   :  { %3454 = vmatpush3.bf16.msra.mxu0 %v3960_v32  ;;  %3458 = vmatprep.subr.bf16.mxu1 %v3719_v27 }
 0xede   :  { %3461 = vmatprep.subr.bf16.mxu0 %v3719_v27 }
 0xee0   :  { %3460 = vmatpush3.bf16.msra.mxu1 %v3966_v34 }
 0xee1   :  { %3467 = vmatprep.subr.bf16.mxu1 %v3719_v27 }
 0xfa6   :  { %v1654_v22 = vpop.f32.mrb[14].mxu1 }
 0xfa7   :  { %v3191_v24 = vpop.f32.mrb[15].mxu1 }
 0xfab   :  { %v1729_v25 = vpop.f32.mrb[30].mxu0 }
 0xfac   :  { %v1730_v26 = vadd.f32 %v1729_v25, %v1654_v22  ;;  %v3202_v29 = vpop.f32.mrb[31].mxu0 }
 0xfae   :  { %v1733_v30 = vadd.f32 %v4002_v43, %v1730_v26  ;;  %v1830_v37 = vpop.f32.mrb[16].mxu1 }
 0xfaf   :  { %v1834_v38 = vadd.f32 %v1830_v37, %v1763_v36  ;;  %v3213_v39 = vpop.f32.mrb[17].mxu1 }
 0xfb0   :  { %3592 = vtanh.f32 %v1733_v30  ;;  %v2788_v42 = vmul.f32 -1.442695, %v1733_v30 }
 0xfb1   :  { %3594 = vtanh.f32 %v1834_v38  ;;  %v2790_v44 = vmul.f32 -1.442695, %v1834_v38 }
 0xfb2   :  { %3596 = vpow2.f32 %v2788_v42 }
 0xfb3   :  { %3598 = vpow2.f32 %v2790_v44 }
 0xfba   :  { %v3593_v40 = vpop.eup %3592 }
 0xfbb   :  { %v3595_v41 = vpop.eup %3594  ;;  %1743 = vrot.lane.b32.xlu0 %v3593_v40, %s3723_s30 }
 0xfbc   :  { %1844 = vrot.lane.b32.xlu1 %v3595_v41, %s3723_s30  ;;  %v3597_v45 = vpop.eup %3596 }
 0xfbd   :  { %v3599_v46 = vpop.eup %3598  ;;  %v1737_v47 = vadd.f32 1.0, %v3597_v45 }
 0xfbe   :  { %v1838_v48 = vadd.f32 1.0, %v3599_v46 }
 0xfbf   :  { %3600 = vrcp.f32 %v1737_v47 }
 0xfc0   :  { %3602 = vrcp.f32 %v1838_v48 }
 0xfc9   :  { %v3601_v49 = vpop.eup %3600 }
 0xfca   :  { %v3603_v51 = vpop.eup %3602  ;;  %v1741_v55 = vmul.f32 %v3601_v49, %v4130_v10 }
 0xfcb   :  { %v1842_v56 = vmul.f32 %v3603_v51, %v4134_v13 }
0x102d   :  { %v1744_v50 = vpop.permute.xlu0 %1743 }
0x102e   :  { %v1845_v52 = vpop.permute.xlu1 %1844  ;;  %v1746_v53 = vmul.f32 %v3601_v49, %v1744_v50 }
0x102f   :  { %v1847_v54 = vmul.f32 %v3603_v51, %v1845_v52 }
0x1030   :  { %1748 = vrot.lane.b32.xlu0 %v1746_v53, %s3724_s17 }
0x1031   :  { %1849 = vrot.lane.b32.xlu1 %v1847_v54, %s3724_s17 }
0x10a2   :  { %v1749_v57 = vpop.permute.xlu0 %1748 }
0x10a3   :  { %v1850_v58 = vpop.permute.xlu1 %1849  ;;  %v4170_v59 = vadd.f32 %v1749_v57, %v1741_v55  ;;  %v2309_v55 = vld [vmem:[#allocation3 + $0xe] sm:$0x3] }
0x10a4   :  { %v4172_v60 = vadd.f32 %v1850_v58, %v1842_v56 }
0x10a5   :  { %3604 = vtanh.f32 %v4170_v59 }
0x10a6   :  { %3606 = vtanh.f32 %v4172_v60 }
0x10af   :  { %v3605_v61 = vpop.eup %3604 }
0x10b0   :  { %v3607_v62 = vpop.eup %3606  ;;  %1754 = vrot.lane.b32.xlu0 %v3605_v61, %s3723_s30 }
0x10b1   :  { %1855 = vrot.lane.b32.xlu1 %v3607_v62, %s3723_s30 }
0x1122   :  { %v1755_v63 = vpop.permute.xlu0 %1754 }
0x1123   :  { %v1856_v0 = vpop.permute.xlu1 %1855  ;;  %v1757_v1 = vmul.f32 %v3601_v49, %v1755_v63 }
0x1124   :  { %v1858_v2 = vmul.f32 %v3603_v51, %v1856_v0 }
0x1125   :  { %1759 = vrot.lane.b32.xlu0 %v1757_v1, %s3724_s17 }
0x1126   :  { %1932 = vrot.lane.b32.xlu1 %v1858_v2, %s3724_s17 }
0x1197   :  { %v1760_v3 = vpop.permute.xlu0 %1759 }
0x1198   :  { %v1933_v4 = vpop.permute.xlu1 %1932  ;;  %1762 = vst.msk [vmem:[#allocation2 + $0x8] sm:$0x3] %vm669_vm4, %v1760_v3  ;;  %3223 = vmatmul.mubr.msk.f32.vlgmr.msra.gmra.mrb[32].mxu0 %vm82_vm0, %v1760_v3 }
0x1199   :  { %3234 = vmatmul.mubr.msk.f32.vlgmr.msra.gmra.mrb[18].mxu1 %vm82_vm0, %v1933_v4  ;;  %3463 = vmatpush3.bf16.msra.mxu0 %v3896_v28 }
0x119a   :  { %3464 = vmatprep.subr.bf16.mxu0 %v3719_v27  ;;  %3244 = vmatprep.mubr.msk.f32.mxu0 %vm3720_vm1, %v3721_v35 }
0x119b   :  { %3469 = vmatpush3.bf16.msra.mxu1 %v3942_v23  ;;  %3255 = vmatprep.mubr.msk.f32.mxu1 %vm3720_vm1, %v3721_v35 }
0x119c   :  { %3470 = vmatprep.subr.bf16.mxu1 %v3719_v27 }
0x119d   :  { %3466 = vmatpush3.bf16.msra.mxu0 %v3906_v31 }
0x119e   :  { %3473 = vmatprep.subr.bf16.mxu0 %v3719_v27 }
0x119f   :  { %3472 = vmatpush3.bf16.msra.mxu1 %v3960_v32 }
0x11a0   :  { %3245 = vmatmul.mubr.msk.f32.vlgmr.msra.gmra.mrb[34].mxu0 %vm82_vm0, %v1933_v4  ;;  %3479 = vmatprep.subr.bf16.mxu1 %v3719_v27 }
0x11a1   :  { %3475 = vmatpush3.bf16.msra.mxu0 %v3962_v33  ;;  %3266 = vmatprep.mubr.msk.f32.mxu0 %vm3720_vm1, %v3721_v35 }
0x11a2   :  { %3476 = vmatprep.subr.bf16.mxu0 %v3719_v27 }
0x11a5   :  { %3478 = vmatpush3.bf16.msra.mxu0 %v3966_v34 }
0x11a6   :  { %3485 = vmatprep.subr.bf16.mxu0 %v3719_v27 }
0x126b   :  { %v1927_v5 = vpop.f32.mrb[32].mxu0 }
0x126c   :  { %v2002_v6 = vpop.f32.mrb[18].mxu1  ;;  %v3224_v7 = vpop.f32.mrb[33].mxu0 }
0x126d   :  { %v2003_v8 = vadd.f32 %v2002_v6, %v1927_v5  ;;  %v3235_v9 = vpop.f32.mrb[19].mxu1 }
0x126f   :  { %v2006_v10 = vadd.f32 %v4002_v43, %v2003_v8 }
0x1271   :  { %3608 = vtanh.f32 %v2006_v10  ;;  %v2793_v17 = vmul.f32 -1.442695, %v2006_v10 }
0x1273   :  { %v2103_v12 = vpop.f32.mrb[34].mxu0 }
0x1274   :  { %v2107_v13 = vadd.f32 %v2103_v12, %v2036_v11  ;;  %v3246_v14 = vpop.f32.mrb[35].mxu0 }
0x1276   :  { %3610 = vtanh.f32 %v2107_v13  ;;  %v2795_v18 = vmul.f32 -1.442695, %v2107_v13 }
0x1277   :  { %3612 = vpow2.f32 %v2793_v17 }
0x1278   :  { %3614 = vpow2.f32 %v2795_v18  ;;  %v2582_v18 = vld [vmem:[#allocation2] sm:$0xff] }
0x127b   :  { %v3609_v15 = vpop.eup %3608 }
0x127c   :  { %2016 = vrot.lane.b32.xlu0 %v3609_v15, %s3723_s30 }
0x1280   :  { %v3611_v16 = vpop.eup %3610 }
0x1281   :  { %2117 = vrot.lane.b32.xlu1 %v3611_v16, %s3723_s30  ;;  %v3613_v19 = vpop.eup %3612 }
0x1282   :  { %v2010_v20 = vadd.f32 1.0, %v3613_v19  ;;  %v3615_v21 = vpop.eup %3614 }
0x1283   :  { %v2111_v22 = vadd.f32 1.0, %v3615_v21 }
0x1284   :  { %3616 = vrcp.f32 %v2010_v20 }
0x1285   :  { %3618 = vrcp.f32 %v2111_v22 }
0x128e   :  { %v3617_v24 = vpop.eup %3616 }
0x128f   :  { %v3619_v29 = vpop.eup %3618  ;;  %v2014_v37 = vmul.f32 %v3617_v24, %v4170_v59 }
0x1290   :  { %v2115_v40 = vmul.f32 %v3619_v29, %v4172_v60 }
0x12ee   :  { %v2017_v25 = vpop.permute.xlu0 %2016 }
0x12ef   :  { %v2019_v26 = vmul.f32 %v3617_v24, %v2017_v25 }
0x12f1   :  { %2021 = vrot.lane.b32.xlu0 %v2019_v26, %s3724_s17 }
0x12f3   :  { %v2118_v30 = vpop.permute.xlu1 %2117 }
0x12f4   :  { %v2120_v36 = vmul.f32 %v3619_v29, %v2118_v30 }
0x12f6   :  { %2122 = vrot.lane.b32.xlu1 %v2120_v36, %s3724_s17 }
0x1363   :  { %v2022_v38 = vpop.permute.xlu0 %2021 }
0x1364   :  { %v4208_v39 = vadd.f32 %v2022_v38, %v2014_v37 }
0x1366   :  { %3620 = vtanh.f32 %v4208_v39 }
0x1368   :  { %v2123_v41 = vpop.permute.xlu1 %2122 }
0x1369   :  { %v4212_v42 = vadd.f32 %v2123_v41, %v2115_v40 }
0x136b   :  { %3622 = vtanh.f32 %v4212_v42 }
0x1370   :  { %v3621_v44 = vpop.eup %3620 }
0x1371   :  { %2027 = vrot.lane.b32.xlu0 %v3621_v44, %s3723_s30 }
0x1375   :  { %v3623_v45 = vpop.eup %3622 }
0x1376   :  { %2128 = vrot.lane.b32.xlu1 %v3623_v45, %s3723_s30  ;;  %v2585_v45 = vld [vmem:[%s4328_s8 + $0x8] sm:$0xff] }
0x13e3   :  { %v2028_v46 = vpop.permute.xlu0 %2027 }
0x13e4   :  { %v2030_v47 = vmul.f32 %v3617_v24, %v2028_v46 }
0x13e6   :  { %2032 = vrot.lane.b32.xlu0 %v2030_v47, %s3724_s17  ;;  %v2586_v47 = vld [vmem:[%s4328_s8 + $0x10] sm:$0xff] }
0x13e8   :  { %v2129_v48 = vpop.permute.xlu1 %2128 }
0x13e9   :  { %v2131_v49 = vmul.f32 %v3619_v29, %v2129_v48  ;;  %v2587_v48 = vld [vmem:[%s4328_s8 + $0x18] sm:$0xff] }
0x13eb   :  { %2205 = vrot.lane.b32.xlu1 %v2131_v49, %s3724_s17  ;;  %v3501_v49 = vpack.c.bf16 %v2587_v48, %v2586_v47 }
0x1458   :  { %v2033_v50 = vpop.permute.xlu0 %2032 }
0x1459   :  { %2035 = vst.msk [vmem:[#allocation2 + $0xa] sm:$0x3] %vm669_vm4, %v2033_v50  ;;  %3256 = vmatmul.mubr.msk.f32.vlgmr.msra.gmra.mrb[20].mxu1 %vm82_vm0, %v2033_v50 }
0x145a   :  { %3481 = vmatpush3.bf16.msra.mxu1 %v3896_v28  ;;  %3277 = vmatprep.mubr.msk.f32.mxu1 %vm3720_vm1, %v3721_v35 }
0x145b   :  { %3482 = vmatprep.subr.bf16.mxu1 %v3719_v27 }
0x145d   :  { %v2206_v51 = vpop.permute.xlu1 %2205 }
0x145e   :  { %3484 = vmatpush3.bf16.msra.mxu1 %v3906_v31  ;;  %3267 = vmatmul.mubr.msk.f32.vlgmr.msra.gmra.mrb[36].mxu0 %vm82_vm0, %v2206_v51 }
0x145f   :  { %3491 = vmatprep.subr.bf16.mxu1 %v3719_v27  ;;  %3487 = vmatpush3.bf16.msra.mxu0 %v3942_v23 }
0x1460   :  { %3488 = vmatprep.subr.bf16.mxu0 %v3719_v27  ;;  %3288 = vmatprep.mubr.msk.f32.mxu0 %vm3720_vm1, %v3721_v35 }
0x1461   :  { %3278 = vmatmul.mubr.msk.f32.vlgmr.msra.gmra.mrb[22].mxu1 %vm82_vm0, %v2206_v51 }
0x1462   :  { %3493 = vmatpush3.bf16.msra.mxu1 %v3962_v33  ;;  %3299 = vmatprep.mubr.msk.f32.mxu1 %vm3720_vm1, %v3721_v35 }
0x1463   :  { %3494 = vmatprep.subr.bf16.mxu1 %v3719_v27  ;;  %3490 = vmatpush3.bf16.msra.mxu0 %v3960_v32 }
0x1466   :  { %3496 = vmatpush3.bf16.msra.mxu1 %v3966_v34 }
0x152c   :  { %v2200_v28 = vpop.f32.mrb[20].mxu1 }
0x152d   :  { %v3257_v31 = vpop.f32.mrb[21].mxu1 }
0x1531   :  { %v2275_v23 = vpop.f32.mrb[36].mxu0 }
0x1532   :  { %v2276_v52 = vadd.f32 %v2275_v23, %v2200_v28  ;;  %v3268_v53 = vpop.f32.mrb[37].mxu0 }
0x1534   :  { %v2279_v54 = vadd.f32 %v4002_v43, %v2276_v52  ;;  %v2376_v56 = vpop.f32.mrb[22].mxu1 }
0x1535   :  { %v2380_v57 = vadd.f32 %v2376_v56, %v2309_v55  ;;  %v3279_v33 = vpop.f32.mrb[23].mxu1 }
0x1536   :  { %3624 = vtanh.f32 %v2279_v54  ;;  %v2798_v27 = vmul.f32 -1.442695, %v2279_v54 }
0x1537   :  { %3626 = vtanh.f32 %v2380_v57  ;;  %v2800_v32 = vmul.f32 -1.442695, %v2380_v57 }
0x1538   :  { %3628 = vpow2.f32 %v2798_v27 }
0x1539   :  { %3630 = vpow2.f32 %v2800_v32 }
0x1540   :  { %v3625_v35 = vpop.eup %3624 }
0x1541   :  { %v3627_v58 = vpop.eup %3626  ;;  %2289 = vrot.lane.b32.xlu0 %v3625_v35, %s3723_s30 }
0x1542   :  { %2390 = vrot.lane.b32.xlu1 %v3627_v58, %s3723_s30  ;;  %v3629_v34 = vpop.eup %3628 }
0x1543   :  { %v3631_v59 = vpop.eup %3630  ;;  %v2283_v60 = vadd.f32 1.0, %v3629_v34 }
0x1544   :  { %v2384_v61 = vadd.f32 1.0, %v3631_v59 }
0x1545   :  { %3632 = vrcp.f32 %v2283_v60 }
0x1546   :  { %3634 = vrcp.f32 %v2384_v61 }
0x154f   :  { %v3633_v62 = vpop.eup %3632 }
0x1550   :  { %v3635_v0 = vpop.eup %3634  ;;  %v2287_v4 = vmul.f32 %v3633_v62, %v4208_v39 }
0x1551   :  { %v2388_v5 = vmul.f32 %v3635_v0, %v4212_v42 }
0x15b3   :  { %v2290_v63 = vpop.permute.xlu0 %2289 }
0x15b4   :  { %v2391_v1 = vpop.permute.xlu1 %2390  ;;  %v2292_v2 = vmul.f32 %v3633_v62, %v2290_v63 }
0x15b5   :  { %v2393_v3 = vmul.f32 %v3635_v0, %v2391_v1 }
0x15b6   :  { %2294 = vrot.lane.b32.xlu0 %v2292_v2, %s3724_s17 }
0x15b7   :  { %2395 = vrot.lane.b32.xlu1 %v2393_v3, %s3724_s17 }
0x1628   :  { %v2295_v6 = vpop.permute.xlu0 %2294 }
0x1629   :  { %v2396_v7 = vpop.permute.xlu1 %2395  ;;  %v2297_v8 = vadd.f32 %v2295_v6, %v2287_v4 }
0x162a   :  { %v2398_v9 = vadd.f32 %v2396_v7, %v2388_v5 }
0x162b   :  { %3636 = vtanh.f32 %v2297_v8 }
0x162c   :  { %3638 = vtanh.f32 %v2398_v9 }
0x1635   :  { %v3637_v10 = vpop.eup %3636 }
0x1636   :  { %v3639_v11 = vpop.eup %3638  ;;  %2300 = vrot.lane.b32.xlu0 %v3637_v10, %s3723_s30 }
0x1637   :  { %2401 = vrot.lane.b32.xlu1 %v3639_v11, %s3723_s30 }
0x16a8   :  { %v2301_v12 = vpop.permute.xlu0 %2300 }
0x16a9   :  { %v2402_v13 = vpop.permute.xlu1 %2401  ;;  %v2303_v14 = vmul.f32 %v3633_v62, %v2301_v12 }
0x16aa   :  { %v2404_v15 = vmul.f32 %v3635_v0, %v2402_v13 }
0x16ab   :  { %2305 = vrot.lane.b32.xlu0 %v2303_v14, %s3724_s17 }
0x16ac   :  { %2478 = vrot.lane.b32.xlu1 %v2404_v15, %s3724_s17 }
0x171d   :  { %v2306_v16 = vpop.permute.xlu0 %2305 }
0x171e   :  { %v2479_v17 = vpop.permute.xlu1 %2478  ;;  %2308 = vst.msk [vmem:[#allocation2 + $0xc] sm:$0x3] %vm669_vm4, %v2306_v16  ;;  %3289 = vmatmul.mubr.msk.f32.vlgmr.msra.gmra.mrb[38].mxu0 %vm82_vm0, %v2306_v16 }
0x171f   :  { %2679 = vst.msk [vmem:[#allocation6] sm:$0x3] %vm669_vm4, %v2479_v17  ;;  %3300 = vmatmul.mubr.msk.f32.vlgmr.msra.gmra.mrb[24].mxu1 %vm82_vm0, %v2479_v17  ;;  %3310 = vmatprep.mubr.msk.f32.mxu0 %vm82_vm0, %v2582_v18 }
0x17f1   :  { %v2473_v19 = vpop.f32.mrb[38].mxu0 }
0x17f2   :  { %v2548_v20 = vpop.f32.mrb[24].mxu1  ;;  %v3290_v21 = vpop.f32.mrb[39].mxu0 }
0x17f3   :  { %v2549_v22 = vadd.f32 %v2548_v20, %v2473_v19  ;;  %v3301_v24 = vpop.f32.mrb[25].mxu1 }
0x17f5   :  { %v2552_v25 = vadd.f32 %v4002_v43, %v2549_v22  ;;  %v2584_v43 = vld [vmem:[%s4328_s8] sm:$0xff]  ;;  %s3726_s8 = smov [#allocation6]  }
0x17f6   :  { %v3497_v46 = vpack.c.bf16 %v2585_v45, %v2584_v43 }
0x17f7   :  { %3640 = vtanh.f32 %v2552_v25  ;;  %v2803_v29 = vmul.f32 -1.442695, %v2552_v25 }
0x17f8   :  { %3498 = vmatprep.subr.bf16.mxu0 %v3497_v46 }
0x17f9   :  { %3642 = vpow2.f32 %v2803_v29  ;;  %3500 = vmatpush3.bf16.msra.mxu0 %v3497_v46 }
0x17fa   :  { %3502 = vmatprep.subr.bf16.mxu0 %v3501_v49 }
0x17fd   :  { %3504 = vmatpush3.bf16.msra.mxu0 %v3501_v49 }
0x1801   :  { %v3641_v26 = vpop.eup %3640 }
0x1802   :  { %2562 = vrot.lane.b32.xlu0 %v3641_v26, %s3723_s30 }
0x1803   :  { %v3643_v30 = vpop.eup %3642 }
0x1804   :  { %v2556_v36 = vadd.f32 1.0, %v3643_v30 }
0x1806   :  { %3644 = vrcp.f32 %v2556_v36 }
0x1810   :  { %v3645_v37 = vpop.eup %3644 }
0x1811   :  { %v2560_v40 = vmul.f32 %v3645_v37, %v2297_v8 }
0x1874   :  { %v2563_v38 = vpop.permute.xlu0 %2562 }
0x1875   :  { %v2565_v39 = vmul.f32 %v3645_v37, %v2563_v38 }
0x1877   :  { %2567 = vrot.lane.b32.xlu1 %v2565_v39, %s3724_s17 }
0x18e9   :  { %v2568_v41 = vpop.permute.xlu1 %2567 }
0x18ea   :  { %v2570_v42 = vadd.f32 %v2568_v41, %v2560_v40 }
0x18ec   :  { %3646 = vtanh.f32 %v2570_v42 }
0x18f6   :  { %v3647_v44 = vpop.eup %3646 }
0x18f7   :  { %2573 = vrot.lane.b32.xlu0 %v3647_v44, %s3723_s30  ;;  %s2710_s30 = sshll.u32 %s3726_s8, 4  ;;  %s2711_s30 = int_to_ptr.vmem [resolvable:$true] %s2710_s30 }
0x18f8   :  { %s3648_s23 = scalar_lea.vmem %s2711_s30, 64  ;;  %p3653_p1 = scmp.lt.s32.totalorder %s2711_s30, %s2711_s30 }
0x18f9   :  { %p3649_p0 = scmp.ne.s32.totalorder %s2711_s30, %s3648_s23  ;;  %p3654_p2 = scmp.lt.s32.totalorder %s3648_s23, %s3648_s23 }
0x18fb   :  { %2683 = vrot.lane.b32.xlu0 %v2398_v9, %s3725_s11  ;;  %p3655_p3 = por %p3654_p2, %p3653_p1 }
0x18fd   :  { %p3656_p4 = pnand %p3655_p3, %p3649_p0 }
0x1969   :  { %v2574_v50 = vpop.permute.xlu0 %2573 }
0x196a   :  { %v2576_v51 = vmul.f32 %v3645_v37, %v2574_v50 }
0x196c   :  { %2578 = vrot.lane.b32.xlu1 %v2576_v51, %s3724_s17 }
0x196d   :  { %v2684_v28 = vpop.permute.xlu0 %2683 }
0x196e   :  { %2686 = vst.msk [vmem:[#allocation8] sm:$0x3] %vm669_vm4, %v2684_v28 }
0x1970   :  { %2688 = vrot.lane.b32.xlu1 %v2570_v42, %s3725_s11 }
0x19de   :  { %v2579_v31 = vpop.permute.xlu1 %2578 }
0x19df   :  { %2581 = vst.msk [vmem:[#allocation2 + $0xe] sm:$0x3] %vm669_vm4, %v2579_v31  ;;  %2681 = vst.msk [vmem:[#allocation6 + $0x2] sm:$0x3] %vm669_vm4, %v2579_v31 }
0x19e2   :  { %v2689_v23 = vpop.permute.xlu1 %2688 }
0x19e3   :  { %2692 = vst.msk [vmem:[#allocation8 + $0x2] sm:$0x3] %vm669_vm4, %v2689_v23 }
0x19e6   :  { %v2583_v52 = vld [vmem:[#allocation2 + $0x8] sm:$0xff] }
0x19e7   :  { %3311 = vmatmul.mubr.msk.f32.vlgmr.msra.gmra.mrb[40].mxu0 %vm82_vm0, %v2583_v52 }
0x19e8   :  { %3659 = shalt.err (!%p3656_p4)
}
0x19e9   :  { %s3660_s2 = scalar_lea.hbm %s4333_s13, 64 }
0x19ea   :  { %p3661_p5 = scmp.ne.s32.totalorder %s4333_s13, %s3660_s2  ;;  %p3664_p6 = scmp.lt.u32.totalorder %s3660_s2, %s4333_s13 }
0x19ec   :  { %p3666_p7 = pnand %p3664_p6, %p3661_p5 }
0x19ee   :  { %3669 = shalt.err (!%p3666_p7)
}
0x19ef   :  { %s3727_s3 = smov 2   ;;  %s3728_s5 = smov [#allocation8]  }
0x19f0   :  { %2716 = dma.vmem_to_hbm [thread:$0]  %s2711_s30, 64, %s4333_s13, [#allocation7], %s3724_s17, %s3724_s17, %s3727_s3  }
0x19f1   :  { %s2722_s10 = sshll.u32 %s3728_s5, 4  ;;  %s2723_s10 = int_to_ptr.vmem [resolvable:$true] %s2722_s10 }
0x19f2   :  { %s3670_s15 = scalar_lea.vmem %s2723_s10, 64  ;;  %p3675_p9 = scmp.lt.s32.totalorder %s2723_s10, %s2723_s10 }
0x19f3   :  { %p3671_p8 = scmp.ne.s32.totalorder %s2723_s10, %s3670_s15  ;;  %p3676_p10 = scmp.lt.s32.totalorder %s3670_s15, %s3670_s15 }
0x19f5   :  { %p3677_p11 = por %p3676_p10, %p3675_p9 }
0x19f7   :  { %p3678_p12 = pnand %p3677_p11, %p3671_p8 }
0x19f9   :  { %3681 = shalt.err (!%p3678_p12)
}
0x19fa   :  { %s3682_s16 = scalar_lea.hbm %s4334_s14, 64 }
0x19fb   :  { %p3683_p13 = scmp.ne.s32.totalorder %s4334_s14, %s3682_s16  ;;  %p3686_p0 = scmp.lt.u32.totalorder %s3682_s16, %s4334_s14 }
0x19fd   :  { %p3688_p1 = pnand %p3686_p0, %p3683_p13 }
0x19ff   :  { %3691 = shalt.err (!%p3688_p1)
}
0x1a00   :  { %2728 = dma.vmem_to_hbm [thread:$0]  %s2723_s10, 64, %s4334_s14, [#allocation7], %s3724_s17, %s3724_s17, %s3727_s3  }
0x1a01   :  { %v2804_v53 = vld [vmem:[%s4329_s9] ss:$0 sm:$0xff]  ;;  %s3729_s8 = smov [#allocation4]  }
0x1a02   :  { %s2698_s30 = sshll.u32 %s3729_s8, 4  ;;  %s2699_s30 = int_to_ptr.vmem [resolvable:$true] %s2698_s30 }
0x1a03   :  { %s3692_s23 = scalar_lea.vmem %s2699_s30, 256  ;;  %p3697_p3 = scmp.lt.s32.totalorder %s2699_s30, %s2699_s30 }
0x1a04   :  { %p3693_p2 = scmp.ne.s32.totalorder %s2699_s30, %s3692_s23  ;;  %p3698_p4 = scmp.lt.s32.totalorder %s3692_s23, %s3692_s23 }
0x1a06   :  { %p3699_p5 = por %p3698_p4, %p3697_p3 }
0x1a08   :  { %p3700_p6 = pnand %p3699_p5, %p3693_p2 }
0x1aba   :  { %v3312_v54 = vpop.f32.mrb[40].mxu0 }
0x1abb   :  { %v2673_v55 = vadd.f32 %v3312_v54, %v2804_v53  ;;  %v2667_v56 = vpop.f32.mrb[41].mxu0 }
0x1abc   :  { %v2668_v57 = vadd.f32 %v2804_v53, %v2667_v56 }
0x1abd   :  { %2677 = vst [vmem:[#allocation4 + $0x8] sm:$0xff] %v2673_v55 }
0x1abe   :  { %2676 = vst [vmem:[#allocation4] sm:$0xff] %v2668_v57 }
0x1abf   :  { %3703 = shalt.err (!%p3700_p6)
}
0x1ac0   :  { %s3704_s9 = scalar_lea.hbm %s4332_s12, 256 }
0x1ac1   :  { %p3705_p7 = scmp.ne.s32.totalorder %s4332_s12, %s3704_s9  ;;  %p3708_p8 = scmp.lt.u32.totalorder %s3704_s9, %s4332_s12 }
0x1ac3   :  { %p3710_p9 = pnand %p3708_p8, %p3705_p7 }
0x1ac5   :  { %3713 = shalt.err (!%p3710_p9)
}
0x1ac6   :  { %s3730_s26 = smov 128   ;;  %s3731_s27 = smov 8  }
0x1ac7   :  { %2704 = dma.vmem_to_hbm [thread:$0]  %s2699_s30, 256, %s4332_s12, [#allocation5], %s3730_s26, %s3730_s26, %s3731_s27  }
0x1ac8   :  { %3714 = dma.done.wait [#allocation5], 256  }
0x1ac9   :  { %3715 = vsyncadd [#allocation5], 4294967040 }
0x1aca   :  { %3716 = dma.done.wait [#allocation7], 128  }
0x1acb   :  { %3717 = vsyncadd [#allocation7], 4294967168 }
0x1acc   :  { %2738 = vsyncpa [#allocation5], 1 }
0x1acd   :  { %2739 = vsyncpa [#allocation7], 1 }

</bundles_post_ra>
